<compile_context>
chip_gen: v6e
topology: v6e:2x2x1
jax: 0.10.0
libtpu: 0.0.40
codegen_flags: <defaults>
</compile_context>

<pallas_src>
import jax
import jax.numpy as jnp
from jax.experimental import pallas as pl
from jax.experimental.pallas import tpu as pltpu


def _round_up(x: int, m: int) -> int:
    return ((x + m - 1) // m) * m


def _pad_to(x, shape):
    if tuple(x.shape) == tuple(shape):
        return x
    pads = [(0, s - d) for d, s in zip(x.shape, shape)]
    return jnp.pad(x, pads)


def _default_vmem_limit() -> int:
    try:
        cap = int(pltpu.get_tpu_info().vmem_capacity_bytes)
    except Exception:
        cap = 64 * 1024 * 1024
    # never request the whole physical VMEM (v7x has only 64 MiB per TC)
    return min(int(cap * 0.75), 100 * 1024 * 1024)


def gin_update_kernel(eps_ref, a_ref, xs_ref, xsT_ref, xd_ref, t_ref,
                      w_ref, b_ref,
                      rst_ref, m_ref, il_ref,
                      acc_ref, mrun_ref, lrun_ref):
    """Per (dst-row tile i, src-col tile k):
         acc  += A[i,k] @ x_src[k]                 (neighbour sum)
         online-softmax stats of scores[i,k] = tanh(x_dst[i]) @ x_src[k]^T
       On the last src tile:
         rst[i] = ((1+eps)*x_dst[i] + acc) @ W + b        (f32)
         m[i], il[i] = row max, 1/denominator of the masked softmax
    """
    k = pl.program_id(1)
    nk = pl.num_programs(1)

    @pl.when(k == 0)
    def _():
        acc_ref[...] = jnp.zeros_like(acc_ref)
        mrun_ref[...] = jnp.full_like(mrun_ref, -jnp.inf)
        lrun_ref[...] = jnp.zeros_like(lrun_ref)

    a_f = a_ref[...].astype(jnp.float32)                  # (TM, TK), 0/1
    a_bf = a_f.astype(jnp.bfloat16)

    # ---- neighbour-sum accumulation (bf16 MXU, f32 accumulate) ----
    acc_ref[...] += jnp.dot(a_bf, xs_ref[...],
                            preferred_element_type=jnp.float32)

    # ---- online softmax statistics over src tiles ----
    # scores[i, j] = <tanh(x_dst[i]), x_src[j]>; RHS is pre-transposed so this
    # is a plain NN matmul (no recurring in-kernel XLU transpose).
    scores = jnp.dot(t_ref[...], xsT_ref[...],
                     preferred_element_type=jnp.float32)  # (TM, TK)
    # Arithmetic masking: adjacency is exactly 0/1, so (a-1)*1e30 pushes
    # non-edges far below any real score without where()/compares.
    masked = scores + (a_f - 1.0) * 1e30
    m_new = jnp.maximum(mrun_ref[...],
                        jnp.max(masked, axis=1, keepdims=True))
    # Clamp before exp: never generates inf even for rows with no edges yet.
    p = jnp.exp(jnp.minimum(masked - m_new, 0.0)) * a_f
    alpha = jnp.exp(jnp.minimum(mrun_ref[...] - m_new, 0.0))
    lrun_ref[...] = alpha * lrun_ref[...] + jnp.sum(p, axis=1, keepdims=True)
    mrun_ref[...] = m_new

    @pl.when(k == nk - 1)
    def _():
        eps = eps_ref[0]
        # Keep h in f32 for the apply_func matmul (precision of high-degree
        # nodes); this matmul is tiny relative to the O(N^2) streams.
        h = (1.0 + eps) * xd_ref[...] + acc_ref[...]
        rst = jnp.dot(h, w_ref[...], preferred_element_type=jnp.float32)
        rst_ref[...] = (rst + b_ref[...]).astype(rst_ref.dtype)
        m_ref[...] = mrun_ref[...]
        denom = lrun_ref[...]
        # Exact reciprocal (once per dst tile; negligible, off DMA path).
        il_ref[...] = jnp.where(denom > 0.0, 1.0 / denom, 0.0)


def gin_esoft_kernel(a_ref, xsT_ref, t_ref, m_ref, il_ref, e_ref):
    """Second pass: re-derive the score tile and write the normalised
    per-destination edge softmax (zeros on non-edges)."""
    scores = jnp.dot(t_ref[...], xsT_ref[...],
                     preferred_element_type=jnp.float32)  # (TM, TK)
    a_f = a_ref[...].astype(jnp.float32)
    p = jnp.exp(jnp.minimum(scores - m_ref[...], 0.0)) * a_f
    e_ref[...] = (p * il_ref[...]).astype(e_ref.dtype)


def gin_conv_forward(adj, feat, w, b, eps, *, block_rows=256, block_cols=512,
                     vmem_limit_bytes=None):
    """GINConv.forward (sum aggregator, Linear apply_func).

    adj : (N, N) 0/1 adjacency, adj[i, j] = 1 iff edge j -> i (int8 preferred).
    feat: (N, D) node features.  w: (D, D_out), b: (D_out,), eps: scalar.

    Returns (rst, [e_soft]):
      rst    : (N, D_out) updated node features (f32)
      e_soft : (N, N) dense per-destination edge softmax (bf16, zeros off-edge)
    """
    N, D = feat.shape
    D_out = w.shape[1]
    if vmem_limit_bytes is None:
        vmem_limit_bytes = _default_vmem_limit()

    # Tile sizes: dst rows (sublanes, multiple of 32 for the int8 adjacency),
    # src cols (lanes, multiple of 128).
    TM = min(block_rows, _round_up(N, 32))
    TK = min(block_cols, _round_up(N, 128))
    Nd = _round_up(N, TM)           # padded destination rows
    Ns = _round_up(N, TK)           # padded source cols
    n_dst, n_src = Nd // TM, Ns // TK

    # Adjacency stays int8 end-to-end (callers should store it as int8/bool to
    # avoid this cast); padded sources/destinations carry adj == 0.
    adj_i8 = adj if adj.dtype == jnp.int8 else adj.astype(jnp.int8)
    adj_i8 = _pad_to(adj_i8, (Nd, Ns))
    # TODO(synk): a ragged-tail masked kernel would avoid the O(N^2) pad and
    # output-slice passes when N is not tile aligned; aligned inputs skip them.

    feat_f32 = feat.astype(jnp.float32)
    feat_bf = feat.astype(jnp.bfloat16)
    xd = _pad_to(feat_f32, (Nd, D))                              # dst feats, f32
    t_bf = _pad_to(jnp.tanh(feat_f32).astype(jnp.bfloat16), (Nd, D))
    xs = _pad_to(feat_bf, (Ns, D))                               # src feats, bf16
    xsT = _pad_to(feat_bf.T, (D, Ns))                            # pre-transposed
    w_f = w.astype(jnp.float32)
    b2d = b.reshape(1, D_out).astype(jnp.float32)
    eps_arr = jnp.asarray([eps], dtype=jnp.float32)

    smem = pl.BlockSpec(memory_space=pltpu.MemorySpace.SMEM)

    # ---- kernel 1: node update + online softmax statistics -----------------
    flops1 = int(4 * Nd * Ns * D + 2 * Nd * D * D_out)
    bytes1 = int(Nd * Ns * 1 + n_dst * Ns * D * 4 + Nd * D * 6
                 + Nd * D_out * 4 + Nd * 8)
    rst_p, m_p, il_p = pl.pallas_call(
        gin_update_kernel,
        out_shape=(jax.ShapeDtypeStruct((Nd, D_out), jnp.float32),
                   jax.ShapeDtypeStruct((Nd, 1), jnp.float32),
                   jax.ShapeDtypeStruct((Nd, 1), jnp.float32)),
        grid=(n_dst, n_src),
        in_specs=[
            smem,                                               # eps (scalar)
            pl.BlockSpec((TM, TK), lambda i, k: (i, k)),        # adj tile (int8)
            pl.BlockSpec((TK, D), lambda i, k: (k, 0)),         # x_src tile
            pl.BlockSpec((D, TK), lambda i, k: (0, k)),         # x_src^T tile
            pl.BlockSpec((TM, D), lambda i, k: (i, 0)),         # x_dst tile (f32)
            pl.BlockSpec((TM, D), lambda i, k: (i, 0)),         # tanh(x_dst) bf16
            pl.BlockSpec((D, D_out), lambda i, k: (0, 0)),      # W (resident)
            pl.BlockSpec((1, D_out), lambda i, k: (0, 0)),      # bias
        ],
        out_specs=(pl.BlockSpec((TM, D_out), lambda i, k: (i, 0)),
                   pl.BlockSpec((TM, 1), lambda i, k: (i, 0)),
                   pl.BlockSpec((TM, 1), lambda i, k: (i, 0))),
        scratch_shapes=[pltpu.VMEM((TM, D), jnp.float32),       # neigh acc
                        pltpu.VMEM((TM, 1), jnp.float32),       # running max
                        pltpu.VMEM((TM, 1), jnp.float32)],      # running denom
        compiler_params=pltpu.CompilerParams(
            dimension_semantics=("parallel", "arbitrary"),
            vmem_limit_bytes=vmem_limit_bytes),
        cost_estimate=pl.CostEstimate(flops=flops1,
                                      transcendentals=int(Nd * Ns),
                                      bytes_accessed=bytes1),
    )(eps_arr, adj_i8, xs, xsT, xd, t_bf, w_f, b2d)

    # ---- kernel 2: normalised dense edge softmax (bf16 output) -------------
    flops2 = int(2 * Nd * Ns * D)
    bytes2 = int(Nd * Ns * 3 + n_dst * Ns * D * 2 + Nd * D * 2 + Nd * 8)
    e_p = pl.pallas_call(
        gin_esoft_kernel,
        out_shape=jax.ShapeDtypeStruct((Nd, Ns), jnp.bfloat16),
        grid=(n_dst, n_src),
        in_specs=[
            pl.BlockSpec((TM, TK), lambda i, k: (i, k)),        # adj tile (int8)
            pl.BlockSpec((D, TK), lambda i, k: (0, k)),         # x_src^T tile
            pl.BlockSpec((TM, D), lambda i, k: (i, 0)),         # tanh(x_dst)
            pl.BlockSpec((TM, 1), lambda i, k: (i, 0)),         # row max
            pl.BlockSpec((TM, 1), lambda i, k: (i, 0)),         # 1/denominator
        ],
        out_specs=pl.BlockSpec((TM, TK), lambda i, k: (i, k)),  # e tile (bf16)
        compiler_params=pltpu.CompilerParams(
            dimension_semantics=("parallel", "parallel"),
            vmem_limit_bytes=vmem_limit_bytes),
        cost_estimate=pl.CostEstimate(flops=flops2,
                                      transcendentals=int(Nd * Ns),
                                      bytes_accessed=bytes2),
    )(adj_i8, xsT, t_bf, m_p, il_p)

    if Nd == N and Ns == N:
        return rst_p, [e_p]
    return rst_p[:N], [e_p[:N, :N]]


def _reference(adj_f, feat, w, b, eps):
    """Pure-JAX reference (bf16-rounded MXU operands mirrored)."""
    feat_q = feat.astype(jnp.bfloat16).astype(jnp.float32)
    neigh = adj_f @ feat_q
    rst = ((1.0 + eps) * feat + neigh) @ w + b
    t_q = jnp.tanh(feat).astype(jnp.bfloat16).astype(jnp.float32)
    scores = t_q @ feat_q.T
    mask = adj_f > 0
    masked = jnp.where(mask, scores, -jnp.inf)
    m = jnp.max(masked, axis=1, keepdims=True)
    m = jnp.where(jnp.isfinite(m), m, 0.0)
    ex = jnp.where(mask, jnp.exp(scores - m), 0.0)
    denom = jnp.sum(ex, axis=1, keepdims=True)
    e = jnp.where(denom > 0, ex / denom, 0.0)
    return rst, e


if __name__ == "__main__":
    key = jax.random.PRNGKey(0)
    k_adj, k_feat, k_w, k_b = jax.random.split(key, 4)

    # Small multi-tile graph; lane-dense feature widths (multiples of 128).
    N, D_in, D_out = 512, 128, 128
    init_eps = 0.0  # GINConv default (learn_eps=False -> fixed buffer)

    # Adjacency constructed directly as int8 (no wrapper-side O(N^2) cast).
    adj_i8 = (jax.random.uniform(k_adj, (N, N)) < 0.05).astype(jnp.int8)
    feat = jax.random.normal(k_feat, (N, D_in), dtype=jnp.float32)

    # Linear apply_func parameters.
    w = jax.random.normal(k_w, (D_in, D_out), dtype=jnp.float32) * 0.1
    b = jax.random.normal(k_b, (D_out,), dtype=jnp.float32) * 0.01

    # Small tiles so the 2-D grid / online-softmax path is exercised
    # (4 dst tiles x 2 src tiles).
    rst, elist = gin_conv_forward(adj_i8, feat, w, b, init_eps,
                                  block_rows=128, block_cols=256)
    rst = jax.block_until_ready(rst)
    e_soft = jax.block_until_ready(elist[0]).astype(jnp.float32)

    rst_ref, e_ref = _reference(adj_i8.astype(jnp.float32), feat, w, b,
                                init_eps)

    rst_err = float(jnp.max(jnp.abs(rst - rst_ref)))
    e_err = float(jnp.max(jnp.abs(e_soft - e_ref)))
    assert jnp.allclose(rst, rst_ref, atol=1e-1, rtol=2e-2), rst_err
    assert jnp.allclose(e_soft, e_ref, atol=3e-2, rtol=3e-2), e_err

    print("KERNEL_OK")
</pallas_src>

<mosaic_0001>
module attributes {stable_mosaic.version = 11 : i64} {
  func.func @gin_update_kernel(%arg0: i32, %arg1: i32, %arg2: memref<1xf32, #tpu.memory_space<smem>>, %arg3: memref<128x256xi8, #tpu.memory_space<vmem>>, %arg4: memref<256x128xbf16, #tpu.memory_space<vmem>>, %arg5: memref<128x256xbf16, #tpu.memory_space<vmem>>, %arg6: memref<128x128xf32, #tpu.memory_space<vmem>>, %arg7: memref<128x128xbf16, #tpu.memory_space<vmem>>, %arg8: memref<128x128xf32, #tpu.memory_space<vmem>>, %arg9: memref<1x128xf32, #tpu.memory_space<vmem>>, %arg10: memref<128x128xf32, #tpu.memory_space<vmem>>, %arg11: memref<128x1xf32, #tpu.memory_space<vmem>>, %arg12: memref<128x1xf32, #tpu.memory_space<vmem>>, %arg13: memref<128x128xf32, #tpu.memory_space<vmem>>, %arg14: memref<128x1xf32, #tpu.memory_space<vmem>>, %arg15: memref<128x1xf32, #tpu.memory_space<vmem>>) attributes {dimension_semantics = [#tpu.dimension_semantics<parallel>, #tpu.dimension_semantics<arbitrary>], iteration_bounds = array<i64: 4, 2>, scalar_prefetch = 0 : i64, scratch_operands = 3 : i64, tpu.core_type = #tpu.core_type<tc>, window_params = [{transform_indices = @transform_0, window_bounds = array<i64: 1>}, {transform_indices = @transform_1, window_bounds = array<i64: 128, 256>}, {transform_indices = @transform_2, window_bounds = array<i64: 256, 128>}, {transform_indices = @transform_3, window_bounds = array<i64: 128, 256>}, {transform_indices = @transform_4, window_bounds = array<i64: 128, 128>}, {transform_indices = @transform_5, window_bounds = array<i64: 128, 128>}, {pipeline_mode = #tpu.pipeline_mode<synchronous>, transform_indices = @transform_6, window_bounds = array<i64: 128, 128>}, {pipeline_mode = #tpu.pipeline_mode<synchronous>, transform_indices = @transform_7, window_bounds = array<i64: 1, 128>}, {transform_indices = @transform_8, window_bounds = array<i64: 128, 128>}, {transform_indices = @transform_9, window_bounds = array<i64: 128, 1>}, {transform_indices = @transform_10, window_bounds = array<i64: 128, 1>}]} {
    %c0_i32 = arith.constant 0 : i32
    %0 = arith.cmpi eq, %arg1, %c0_i32 : i32
    %1 = arith.extui %0 : i1 to i32
    %c0_i32_0 = arith.constant 0 : i32
    %2 = arith.cmpi ne, %1, %c0_i32_0 : i32
    scf.if %2 {
      %cst_30 = arith.constant 0.000000e+00 : f32
      %44 = vector.broadcast %cst_30 : f32 to vector<128x128xf32>
      %c0_31 = arith.constant 0 : index
      %c0_32 = arith.constant 0 : index
      %45 = vector.load %arg13[%c0_31, %c0_32] : memref<128x128xf32, #tpu.memory_space<vmem>>, vector<128x128xf32>
      tpu.vector_store %arg13[%c0_31, %c0_32], %44 {strides = array<i32>} : memref<128x128xf32, #tpu.memory_space<vmem>>, vector<128x128xf32>,
      %cst_33 = arith.constant 0xFF800000 : f32
      %46 = vector.broadcast %cst_33 : f32 to vector<128x1xf32>
      %c0_34 = arith.constant 0 : index
      %c0_35 = arith.constant 0 : index
      %47 = vector.load %arg14[%c0_34, %c0_35] : memref<128x1xf32, #tpu.memory_space<vmem>>, vector<128x1xf32>
      tpu.vector_store %arg14[%c0_34, %c0_35], %46 {strides = array<i32>} : memref<128x1xf32, #tpu.memory_space<vmem>>, vector<128x1xf32>,
      %cst_36 = arith.constant 0.000000e+00 : f32
      %48 = vector.broadcast %cst_36 : f32 to vector<128x1xf32>
      %c0_37 = arith.constant 0 : index
      %c0_38 = arith.constant 0 : index
      %49 = vector.load %arg15[%c0_37, %c0_38] : memref<128x1xf32, #tpu.memory_space<vmem>>, vector<128x1xf32>
      tpu.vector_store %arg15[%c0_37, %c0_38], %48 {strides = array<i32>} : memref<128x1xf32, #tpu.memory_space<vmem>>, vector<128x1xf32>,
    } else {
    }
    %c0 = arith.constant 0 : index
    %c0_1 = arith.constant 0 : index
    %3 = vector.load %arg3[%c0, %c0_1] : memref<128x256xi8, #tpu.memory_space<vmem>>, vector<128x256xi8>
    %4 = arith.sitofp %3 : vector<128x256xi8> to vector<128x256xf32>
    %5 = arith.truncf %4 : vector<128x256xf32> to vector<128x256xbf16>
    %c0_2 = arith.constant 0 : index
    %c0_3 = arith.constant 0 : index
    %6 = vector.load %arg13[%c0_2, %c0_3] : memref<128x128xf32, #tpu.memory_space<vmem>>, vector<128x128xf32>
    %c0_4 = arith.constant 0 : index
    %c0_5 = arith.constant 0 : index
    %7 = vector.load %arg4[%c0_4, %c0_5] : memref<256x128xbf16, #tpu.memory_space<vmem>>, vector<256x128xbf16>
    %cst = arith.constant dense<0.000000e+00> : vector<128x128xf32>
    %8 = tpu.matmul %5, %7, %cst {dimension_numbers = #tpu.dot_dimension_numbers<[1], [0], [0], [1], [0, 0, 1, 1], [], []>} : vector<128x256xbf16>, vector<256x128xbf16>, vector<128x128xf32> -> vector<128x128xf32>
    %9 = arith.addf %6, %8 : vector<128x128xf32>
    %c0_6 = arith.constant 0 : index
    %c0_7 = arith.constant 0 : index
    %10 = vector.load %arg13[%c0_6, %c0_7] : memref<128x128xf32, #tpu.memory_space<vmem>>, vector<128x128xf32>
    tpu.vector_store %arg13[%c0_6, %c0_7], %9 {strides = array<i32>} : memref<128x128xf32, #tpu.memory_space<vmem>>, vector<128x128xf32>,
    %c0_8 = arith.constant 0 : index
    %c0_9 = arith.constant 0 : index
    %11 = vector.load %arg7[%c0_8, %c0_9] : memref<128x128xbf16, #tpu.memory_space<vmem>>, vector<128x128xbf16>
    %c0_10 = arith.constant 0 : index
    %c0_11 = arith.constant 0 : index
    %12 = vector.load %arg5[%c0_10, %c0_11] : memref<128x256xbf16, #tpu.memory_space<vmem>>, vector<128x256xbf16>
    %cst_12 = arith.constant dense<0.000000e+00> : vector<128x256xf32>
    %13 = tpu.matmul %11, %12, %cst_12 {dimension_numbers = #tpu.dot_dimension_numbers<[1], [0], [0], [1], [0, 0, 1, 1], [], []>} : vector<128x128xbf16>, vector<128x256xbf16>, vector<128x256xf32> -> vector<128x256xf32>
    %cst_13 = arith.constant 1.000000e+00 : f32
    %14 = vector.broadcast %cst_13 : f32 to vector<128x256xf32>
    %15 = arith.subf %4, %14 : vector<128x256xf32>
    %cst_14 = arith.constant 1.000000e+30 : f32
    %16 = vector.broadcast %cst_14 : f32 to vector<128x256xf32>
    %17 = arith.mulf %15, %16 : vector<128x256xf32>
    %18 = arith.addf %13, %17 : vector<128x256xf32>
    %c0_15 = arith.constant 0 : index
    %c0_16 = arith.constant 0 : index
    %19 = vector.load %arg14[%c0_15, %c0_16] : memref<128x1xf32, #tpu.memory_space<vmem>>, vector<128x1xf32>
    %cst_17 = arith.constant dense<0xFF800000> : vector<128xf32>
    %20 = vector.multi_reduction <maximumf>, %18, %cst_17 [1] : vector<128x256xf32> to vector<128xf32>
    %21 = vector.shape_cast %20 : vector<128xf32> to vector<128x1xf32>
    %22 = arith.maximumf %19, %21 : vector<128x1xf32>
    %23 = vector.broadcast %22 : vector<128x1xf32> to vector<128x256xf32>
    %24 = arith.subf %18, %23 : vector<128x256xf32>
    %cst_18 = arith.constant 0.000000e+00 : f32
    %25 = vector.broadcast %cst_18 : f32 to vector<128x256xf32>
    %26 = arith.minimumf %24, %25 : vector<128x256xf32>
    %27 = math.exp %26 : vector<128x256xf32>
    %28 = arith.mulf %27, %4 : vector<128x256xf32>
    %c0_19 = arith.constant 0 : index
    %c0_20 = arith.constant 0 : index
    %29 = vector.load %arg14[%c0_19, %c0_20] : memref<128x1xf32, #tpu.memory_space<vmem>>, vector<128x1xf32>
    %30 = arith.subf %29, %22 : vector<128x1xf32>
    %cst_21 = arith.constant 0.000000e+00 : f32
    %31 = vector.broadcast %cst_21 : f32 to vector<128x1xf32>
    %32 = arith.minimumf %30, %31 : vector<128x1xf32>
    %33 = math.exp %32 : vector<128x1xf32>
    %c0_22 = arith.constant 0 : index
    %c0_23 = arith.constant 0 : index
    %34 = vector.load %arg15[%c0_22, %c0_23] : memref<128x1xf32, #tpu.memory_space<vmem>>, vector<128x1xf32>
    %35 = arith.mulf %33, %34 : vector<128x1xf32>
    %cst_24 = arith.constant dense<0.000000e+00> : vector<128xf32>
    %36 = vector.multi_reduction <add>, %28, %cst_24 [1] : vector<128x256xf32> to vector<128xf32>
    %37 = vector.shape_cast %36 : vector<128xf32> to vector<128x1xf32>
    %38 = arith.addf %35, %37 : vector<128x1xf32>
    %c0_25 = arith.constant 0 : index
    %c0_26 = arith.constant 0 : index
    %39 = vector.load %arg15[%c0_25, %c0_26] : memref<128x1xf32, #tpu.memory_space<vmem>>, vector<128x1xf32>
    tpu.vector_store %arg15[%c0_25, %c0_26], %38 {strides = array<i32>} : memref<128x1xf32, #tpu.memory_space<vmem>>, vector<128x1xf32>,
    %c0_27 = arith.constant 0 : index
    %c0_28 = arith.constant 0 : index
    %40 = vector.load %arg14[%c0_27, %c0_28] : memref<128x1xf32, #tpu.memory_space<vmem>>, vector<128x1xf32>
    tpu.vector_store %arg14[%c0_27, %c0_28], %22 {strides = array<i32>} : memref<128x1xf32, #tpu.memory_space<vmem>>, vector<128x1xf32>,
    %c1_i32 = arith.constant 1 : i32
    %41 = arith.cmpi eq, %arg1, %c1_i32 : i32
    %42 = arith.extui %41 : i1 to i32
    %c0_i32_29 = arith.constant 0 : i32
    %43 = arith.cmpi ne, %42, %c0_i32_29 : i32
    scf.if %43 {
      %c0_30 = arith.constant 0 : index
      %44 = memref.load %arg2[%c0_30] : memref<1xf32, #tpu.memory_space<smem>>
      %cst_31 = arith.constant 1.000000e+00 : f32
      %45 = arith.addf %cst_31, %44 : f32
      %c0_32 = arith.constant 0 : index
      %c0_33 = arith.constant 0 : index
      %46 = vector.load %arg6[%c0_32, %c0_33] : memref<128x128xf32, #tpu.memory_space<vmem>>, vector<128x128xf32>
      %47 = vector.broadcast %45 : f32 to vector<128x128xf32>
      %48 = arith.mulf %47, %46 : vector<128x128xf32>
      %c0_34 = arith.constant 0 : index
      %c0_35 = arith.constant 0 : index
      %49 = vector.load %arg13[%c0_34, %c0_35] : memref<128x128xf32, #tpu.memory_space<vmem>>, vector<128x128xf32>
      %50 = arith.addf %48, %49 : vector<128x128xf32>
      %c0_36 = arith.constant 0 : index
      %c0_37 = arith.constant 0 : index
      %51 = vector.load %arg8[%c0_36, %c0_37] : memref<128x128xf32, #tpu.memory_space<vmem>>, vector<128x128xf32>
      %cst_38 = arith.constant dense<0.000000e+00> : vector<128x128xf32>
      %52 = tpu.matmul %50, %51, %cst_38 {dimension_numbers = #tpu.dot_dimension_numbers<[1], [0], [0], [1], [0, 0, 1, 1], [], []>} : vector<128x128xf32>, vector<128x128xf32>, vector<128x128xf32> -> vector<128x128xf32>
      %c0_39 = arith.constant 0 : index
      %c0_40 = arith.constant 0 : index
      %53 = vector.load %arg9[%c0_39, %c0_40] : memref<1x128xf32, #tpu.memory_space<vmem>>, vector<1x128xf32>
      %54 = vector.broadcast %53 : vector<1x128xf32> to vector<128x128xf32>
      %55 = arith.addf %52, %54 : vector<128x128xf32>
      %c0_41 = arith.constant 0 : index
      %c0_42 = arith.constant 0 : index
      %56 = vector.load %arg10[%c0_41, %c0_42] : memref<128x128xf32, #tpu.memory_space<vmem>>, vector<128x128xf32>
      tpu.vector_store %arg10[%c0_41, %c0_42], %55 {strides = array<i32>} : memref<128x128xf32, #tpu.memory_space<vmem>>, vector<128x128xf32>,
      %c0_43 = arith.constant 0 : index
      %c0_44 = arith.constant 0 : index
      %57 = vector.load %arg14[%c0_43, %c0_44] : memref<128x1xf32, #tpu.memory_space<vmem>>, vector<128x1xf32>
      %c0_45 = arith.constant 0 : index
      %c0_46 = arith.constant 0 : index
      %58 = vector.load %arg11[%c0_45, %c0_46] : memref<128x1xf32, #tpu.memory_space<vmem>>, vector<128x1xf32>
      tpu.vector_store %arg11[%c0_45, %c0_46], %57 {strides = array<i32>} : memref<128x1xf32, #tpu.memory_space<vmem>>, vector<128x1xf32>,
      %c0_47 = arith.constant 0 : index
      %c0_48 = arith.constant 0 : index
      %59 = vector.load %arg15[%c0_47, %c0_48] : memref<128x1xf32, #tpu.memory_space<vmem>>, vector<128x1xf32>
      %cst_49 = arith.constant 0.000000e+00 : f32
      %60 = vector.broadcast %cst_49 : f32 to vector<128x1xf32>
      %61 = arith.cmpf ogt, %59, %60 : vector<128x1xf32>
      %cst_50 = arith.constant 1.000000e+00 : f32
      %62 = vector.broadcast %cst_50 : f32 to vector<128x1xf32>
      %63 = arith.divf %62, %59 : vector<128x1xf32>
      %cst_51 = arith.constant 0.000000e+00 : f32
      %64 = vector.broadcast %cst_51 : f32 to vector<128x1xf32>
      %65 = arith.select %61, %63, %64 : vector<128x1xi1>, vector<128x1xf32>
      %c0_52 = arith.constant 0 : index
      %c0_53 = arith.constant 0 : index
      %66 = vector.load %arg12[%c0_52, %c0_53] : memref<128x1xf32, #tpu.memory_space<vmem>>, vector<128x1xf32>
      tpu.vector_store %arg12[%c0_52, %c0_53], %65 {strides = array<i32>} : memref<128x1xf32, #tpu.memory_space<vmem>>, vector<128x1xf32>,
    } else {
    }
    return
  }
  func.func @transform_0(%arg0: i32, %arg1: i32) -> i32 {
    %c0_i32 = arith.constant 0 : i32
    %c0_i32_0 = arith.constant 0 : i32
    return %c0_i32 : i32
  }
  func.func @transform_1(%arg0: i32, %arg1: i32) -> (i32, i32) {
    %c0_i32 = arith.constant 0 : i32
    return %arg0, %arg1 : i32, i32
  }
  func.func @transform_2(%arg0: i32, %arg1: i32) -> (i32, i32) {
    %c0_i32 = arith.constant 0 : i32
    %c0_i32_0 = arith.constant 0 : i32
    return %arg1, %c0_i32 : i32, i32
  }
  func.func @transform_3(%arg0: i32, %arg1: i32) -> (i32, i32) {
    %c0_i32 = arith.constant 0 : i32
    %c0_i32_0 = arith.constant 0 : i32
    return %c0_i32, %arg1 : i32, i32
  }
  func.func @transform_4(%arg0: i32, %arg1: i32) -> (i32, i32) {
    %c0_i32 = arith.constant 0 : i32
    %c0_i32_0 = arith.constant 0 : i32
    return %arg0, %c0_i32 : i32, i32
  }
  func.func @transform_5(%arg0: i32, %arg1: i32) -> (i32, i32) {
    %c0_i32 = arith.constant 0 : i32
    %c0_i32_0 = arith.constant 0 : i32
    return %arg0, %c0_i32 : i32, i32
  }
  func.func @transform_6(%arg0: i32, %arg1: i32) -> (i32, i32) {
    %c0_i32 = arith.constant 0 : i32
    %c0_i32_0 = arith.constant 0 : i32
    %c0_i32_1 = arith.constant 0 : i32
    return %c0_i32, %c0_i32_0 : i32, i32
  }
  func.func @transform_7(%arg0: i32, %arg1: i32) -> (i32, i32) {
    %c0_i32 = arith.constant 0 : i32
    %c0_i32_0 = arith.constant 0 : i32
    %c0_i32_1 = arith.constant 0 : i32
    return %c0_i32, %c0_i32_0 : i32, i32
  }
  func.func @transform_8(%arg0: i32, %arg1: i32) -> (i32, i32) {
    %c0_i32 = arith.constant 0 : i32
    %c0_i32_0 = arith.constant 0 : i32
    return %arg0, %c0_i32 : i32, i32
  }
  func.func @transform_9(%arg0: i32, %arg1: i32) -> (i32, i32) {
    %c0_i32 = arith.constant 0 : i32
    %c0_i32_0 = arith.constant 0 : i32
    return %arg0, %c0_i32 : i32, i32
  }
  func.func @transform_10(%arg0: i32, %arg1: i32) -> (i32, i32) {
    %c0_i32 = arith.constant 0 : i32
    %c0_i32_0 = arith.constant 0 : i32
    return %arg0, %c0_i32 : i32, i32
  }
}

</mosaic_0001>

<bundles_post_ra>
// kernel: tpu_custom_call.1
= control target key start
LH: loop header
LB: loop body
LE: loop exit
PB: predicated region body
PF: predicated region fallthrough
CT: control target
= control target key end

     0   :  { %s4827_s0 = inlined_call_operand.<no memory space> [shape: f32[1], index: 0, kind: input, shape index: {}]   ;;  %s4828_s1 = inlined_call_operand.hbm [shape: s8[512,512], index: 1, kind: input, shape index: {}]   ;;  %s4829_s2 = inlined_call_operand.hbm [shape: bf16[512,128], index: 2, kind: input, shape index: {}]   ;;  %s4830_s3 = inlined_call_operand.hbm [shape: bf16[128,512], index: 3, kind: input, shape index: {}]   ;;  %s4831_s4 = inlined_call_operand.hbm [shape: f32[512,128], index: 4, kind: input, shape index: {}]   ;;  %s4832_s5 = inlined_call_operand.hbm [shape: bf16[512,128], index: 5, kind: input, shape index: {}]   ;;  %s4833_s6 = inlined_call_operand.hbm [shape: f32[128,128], index: 6, kind: input, shape index: {}]   ;;  %s4834_s7 = inlined_call_operand.vmem [shape: f32[1,128], index: 7, kind: input, shape index: {}]   ;;  %s4835_s8 = inlined_call_operand.hbm [shape: f32[512,128], index: 8, kind: output, shape index: {0}]   ;;  %s4836_s9 = inlined_call_operand.vmem [shape: f32[512,1], index: 9, kind: output, shape index: {1}]   ;;  %s4837_s10 = inlined_call_operand.vmem [shape: f32[512,1], index: 10, kind: output, shape index: {2}]  }
   0x1   :  { %4920 = sst [smem:[#allocation89_spill]] %s4828_s1 }
   0x2   :  { %4921 = sst [smem:[#allocation90_spill]] %s4829_s2 }
   0x3   :  { %4922 = sst [smem:[#allocation91_spill]] %s4830_s3 }
   0x4   :  { %4923 = sst [smem:[#allocation92_spill]] %s4831_s4 }
   0x5   :  { %4924 = sst [smem:[#allocation93_spill]] %s4832_s5 }
   0x6   :  { %4925 = sst [smem:[#allocation94_spill]] %s4833_s6 }
   0x7   :  { %4926 = sst [smem:[#allocation95_spill]] %s4834_s7 }
   0x8   :  { %4927 = sst [smem:[#allocation96_spill]] %s4835_s8 }
   0x9   :  { %4928 = sst [smem:[#allocation97_spill]] %s4836_s9 }
   0xa   :  { %4929 = sst [smem:[#allocation98_spill]] %s4837_s10 }
   0xb   :  { %16 = sst [smem:[#allocation5]] %s4827_s0 }
   0xc   :  { %17 = vsyncpa [#allocation7], 0 }
   0xd   :  { %19 = vsyncpa [#allocation7 + $0x1], 0 }
   0xe   :  { %20 = vsyncpa [#allocation10], 0 }
   0xf   :  { %22 = vsyncpa [#allocation10 + $0x1], 0 }
  0x10   :  { %23 = vsyncpa [#allocation13], 0 }
  0x11   :  { %25 = vsyncpa [#allocation13 + $0x1], 0 }
  0x12   :  { %26 = vsyncpa [#allocation16], 0 }
  0x13   :  { %27 = vsyncpa [#allocation8], 0 }
  0x14   :  { %29 = vsyncpa [#allocation8 + $0x1], 0  ;;  %s3564_s15 = smov 0   ;;  %s3566_s16 = smov 0  }
  0x15   :  { %s3568_s17 = smov 0   ;;  %s3570_s18 = smov 0  }
  0x16   :  { %s3572_s19 = smov 0   ;;  %s3574_s0 = smov 0  }
  0x17   :  { %s3576_s20 = smov 0   ;;  %s3578_s21 = smov 0  }
  0x18   :  { %s3580_s22 = smov 0   ;;  %s3582_s23 = smov 0  }
  0x19   :  { %s3584_s24 = smov 0   ;;  %s3586_s25 = smov 0  }
  0x1a   :  { %s3588_s26 = smov 0   ;;  %s3590_s27 = smov 0  }
  0x1b LB: > { %4930 = sst [smem:[#allocation23_spill]] %s3433_s15  ;;  %s44_s28 = sadd.s32 1, %s3477_s25  ;;  %s3485_s27 = sphi %s3590_s27, %s35_s27   ;;  %s3481_s26 = sphi %s3588_s26, %s5127_s26   ;;  %s3477_s25 = sphi %s3586_s25, %s5126_s25   ;;  %s3473_s24 = sphi %s3584_s24, %s5125_s24   ;;  %s3469_s23 = sphi %s3582_s23, %s5124_s23   ;;  %s3465_s22 = sphi %s3580_s22, %s5115_s22   ;;  %s3461_s21 = sphi %s3578_s21, %s5123_s21   ;;  %s3457_s20 = sphi %s3576_s20, %s5122_s20   ;;  %s3453_s0 = sphi %s3574_s0, %s5113_s0   ;;  %s3449_s19 = sphi %s3572_s19, %s5121_s19   ;;  %s3445_s18 = sphi %s3570_s18, %s5120_s18   ;;  %s3441_s17 = sphi %s3568_s17, %s5119_s17   ;;  %s3437_s16 = sphi %s3566_s16, %s5110_s16   ;;  %s3433_s15 = sphi %s3564_s15, %s5109_s15  }
  0x1c   : > { %4931 = sst [smem:[#allocation24_spill]] %s3437_s16  ;;  %p4851_p0 = scmp.eq.s32.totalorder %s3485_s27, 0 }
  0x1d   : > { %4932 = sst [smem:[#allocation25_spill]] %s3441_s17  ;;  %p3636_p1 = scmp.ge.s32.totalorder %s44_s28, 2 }
  0x1e   : > { %4933 = sst [smem:[#allocation26_spill]] %s3453_s0  ;;  %s103_s30 = sadd.s32 1, %s3453_s0 }
  0x1f   : > { %4934 = sst [smem:[#allocation27_spill]] %s3465_s22  ;;  %p110_p2 = scmp.ne.s32.totalorder %s3453_s0, %s3449_s19 }
  0x20   : > { %4935 = sst [smem:[#allocation28_spill]] %s3469_s23  ;;  %p116_p3 = scmp.ne.s32.totalorder %s3449_s19, %s3445_s18 }
  0x21   : > { %4936 = sst [smem:[#allocation29_spill]] %s3473_s24  ;;  %s5129_s28 = smov (%p3636_p1, %s44_s28), 0 }
  0x22   : > { %4937 = sst [smem:[#allocation30_spill]] %s3485_s27  ;;  %p112_p4 = por %p110_p2, %p4851_p0 }
  0x23   : > { %4939 = sst [smem:[#allocation31_spill]] %s5129_s28  ;;  %s3653_s11 = ssub.s32 %s3477_s25, %s5129_s28 }
  0x24   : > { %p4850_p5 = scmp.lt.s32.totalorder %s3485_s27, 8  ;;  %p101_p6 = scmp.eq.s32.totalorder %s3653_s11, 0 }
  0x25   : > { %s4840_s12 = sand.u32 1, %s3485_s27   ;;  %s383_s13 = sand.u32 1, %s3453_s0  }
  0x26   : > { %s3660_s14 = scalar_select %p101_p6, %s3453_s0, %s103_s30  }
  0x27   : > { %s3662_s8 = sshll.u32 %s383_s13, 7  ;;  %s2627_s7 = sshll.u32 %s3477_s25, 11 }
  0x28   : > { %4940 = sst [smem:[#allocation32_spill]] %s3660_s14  ;;  %s385_s24 = scalar_lea.vmem [#allocation9], %s3662_s8 }
  0x29   : > { %s4941_s2 = sld [smem:[#allocation90_spill]]  ;;  %s392_s5 = sshll.u32 %s385_s24, 4  ;;  %s393_s5 = int_to_ptr.vmem [resolvable:$true] %s392_s5 }
  0x2a   : > { %p3671_p7 = pnand %p4850_p5, %p112_p4  ;;  %s3677_s30 = scalar_lea.sflag [#allocation10], %s4840_s12 }
  0x2b   : > { %4944 = sst [smem:[#allocation34_spill]] %s3677_s30  ;;  %s3176_s13 = scalar_lea.vmem %s393_s5, 2048 }
  0x2c   : > { %s4942_s28 = scalar_select %p3671_p7, 1, 0 }
  0x2d   : > { %p4849_p8 = pneg %p3671_p7  ;;  %p3177_p9 = scmp.ne.s32.totalorder %s393_s5, %s3176_s13 }
  0x2e   : > { %4943 = sst [smem:[#allocation33_spill]] %s4942_s28 }
  0x2f   : > { %s391_s9 = scalar_lea.hbm %s4941_s2, %s2627_s7  ;;  %p3179_p10 = pnand %p3177_p9, %p4849_p8 }
  0x30   : > { %s3487_s7 = smov [#allocation9]  }
  0x31   : > { %p3180_p11 = pneg %p3179_p10  ;;  %s3181_s10 = sshll.u32 %s3487_s7, 4  ;;  %s3182_s10 = int_to_ptr.vmem [resolvable:$false] %s3181_s10 }
  0x32   : > { %s3183_s23 = scalar_lea.vmem %s3182_s10, 4096  ;;  %p3184_p12 = scmp.lt.s32.totalorder %s393_s5, %s3182_s10 }
  0x33   : > { %p3185_p13 = scmp.lt.s32.totalorder %s3183_s23, %s3176_s13 }
  0x35   : > { %p3186_p2 = por %p3185_p13, %p3184_p12 }
  0x37   : > { %p3187_p4 = pnand %p3186_p2, %p3180_p11 }
  0x39   : > { %3190 = shalt.err (!%p3187_p4)
}
  0x3a   : > { %s4841_s24 = smov 64   ;;  %s4842_s13 = smov 4  }
  0x3b   : > { %2842 = dma.hbm_to_vmem [thread:$0]  (!%p3671_p7), %s391_s9, 2048, %s393_s5, %s3677_s30, %s4841_s24, %s4841_s24, %s4842_s13  }
  0x3c   : > { %s406_s7 = scalar_lea.vmem [#allocation11], %s3662_s8  ;;  %s2513_s23 = sadd.s32 4294967294, %s3485_s27  }
  0x3d   : > { %s413_s10 = sshll.u32 %s406_s7, 4  ;;  %s47_s12 = sadd.s32 1, %s3481_s26  ;;  %s3691_s10 = int_to_ptr.vmem [resolvable:$true] %s413_s10 }
  0x3e   : > { %s155_s2 = sadd.s32 1, %s3441_s17  ;;  %s5131_s12 = smov (!%p3636_p1, %s47_s12), %s3481_s26 }
  0x3f   : > { %p162_p6 = scmp.ne.s32.totalorder %s3441_s17, %s3437_s16  ;;  %p168_p9 = scmp.ne.s32.totalorder %s3437_s16, %s3433_s15 }
  0x40   : > { %p49_p10 = scmp.ge.s32.totalorder %s5131_s12, 4  ;;  %p266_p11 = scmp.eq.s32.totalorder %s2513_s23, 7 }
  0x41   : > { %p164_p12 = por %p162_p6, %p4851_p0  ;;  %s425_s9 = sand.u32 1, %s3441_s17  }
  0x42   : > { %s5133_s12 = smov (%p49_p10, %s5131_s12), 0  ;;  %p3713_p13 = por %p266_p11, %p168_p9 }
  0x43   : > { %4945 = sst [smem:[#allocation35_spill]] %s5133_s12  ;;  %s3719_s8 = ssub.s32 %s3481_s26, %s5133_s12 }
  0x44   : > { %s4946_s5 = scalar_select %p3713_p13, 1, 0 }
  0x45   : > { %p153_p1 = scmp.eq.s32.totalorder %s3719_s8, 0  ;;  %s2528_s29 = sshll.u32 %s425_s9, 7 }
  0x46   : > { %4947 = sst [smem:[#allocation36_spill]] %s4946_s5  ;;  %s2629_s7 = sshll.u32 %s3481_s26, 11 }
  0x47   : > { %s3725_s23 = scalar_select %p153_p1, %s3441_s17, %s155_s2  }
  0x48   : > { %s4949_s4 = sld [smem:[#allocation92_spill]]  ;;  %s427_s0 = scalar_lea.vmem [#allocation12], %s2528_s29 }
  0x49   : > { %4948 = sst [smem:[#allocation37_spill]] %s3725_s23  ;;  %s434_s30 = sshll.u32 %s427_s0, 4  ;;  %s435_s30 = int_to_ptr.vmem [resolvable:$true] %s434_s30 }
  0x4a   : > { %p3732_p2 = pnand %p4850_p5, %p164_p12  ;;  %s2531_s12 = sshll.u32 %s425_s9, 6 }
  0x4b   : > { %s4951_s5 = sand.u32 1, %s3485_s27   ;;  %s3204_s2 = scalar_lea.vmem %s435_s30, 2048 }
  0x4c   : > { %s4950_s3 = scalar_select %p3732_p2, 1, 0 }
  0x4d   : > { %s3738_s28 = scalar_lea.sflag [#allocation13], %s4951_s5  ;;  %p4852_p4 = pneg %p3732_p2 }
  0x4e   : > { %s433_s14 = scalar_lea.hbm %s4949_s4, %s2629_s7  ;;  %p3205_p10 = scmp.ne.s32.totalorder %s435_s30, %s3204_s2 }
  0x4f   : > { %s3490_s0 = smov [#allocation12]  }
  0x50   : > { %p3207_p11 = pnand %p3205_p10, %p4852_p4  ;;  %s3209_s24 = sshll.u32 %s3490_s0, 4  ;;  %s3210_s24 = int_to_ptr.vmem [resolvable:$false] %s3209_s24 }
  0x51   : > { %s3211_s13 = scalar_lea.vmem %s3210_s24, 4096  ;;  %p3212_p12 = scmp.lt.s32.totalorder %s435_s30, %s3210_s24 }
  0x52   : > { %p3208_p1 = pneg %p3207_p11  ;;  %p3213_p8 = scmp.lt.s32.totalorder %s3211_s13, %s3204_s2 }
  0x54   : > { %p3214_p5 = por %p3213_p8, %p3212_p12 }
  0x56   : > { %p3215_p0 = pnand %p3214_p5, %p3208_p1 }
  0x58   : > { %3218 = shalt.err (!%p3215_p0)
}
  0x59   : > { %s4862_s9 = smov 128   ;;  %s4863_s5 = smov 8  }
  0x5a   : > { %2848 = dma.hbm_to_vmem [thread:$0]  (!%p3732_p2), %s433_s14, 2048, %s435_s30, %s3738_s28, %s4862_s9, %s4862_s9, %s4863_s5  }
  0x5b   : > { %s448_s29 = scalar_lea.vmem [#allocation14], %s2531_s12  ;;  %s3754_s2 = sadd.s32 4294967295, %s3485_s27  }
  0x5c   : > { %s3751_s7 = sshll.u32 %s448_s29, 4  ;;  %p4864_p0 = scmp.eq.s32.totalorder %s3754_s2, 0  ;;  %s456_s7 = int_to_ptr.vmem [resolvable:$true] %s3751_s7 }
  0x5d   : > { %p260_p5 = scmp.eq.s32.totalorder %s3754_s2, 7  ;;  %p2514_p8 = scmp.ge.s32.totalorder %s3485_s27, 1 }
  0x5e   : > { %p325_p10 = scmp.lt.s32.totalorder %s3485_s27, 9  ;;  %p3765_p11 = por %p116_p3, %p4864_p0 }
  0x5f   : > { %p3774_p1 = por %p168_p9, %p4864_p0  ;;  %p3781_p12 = por %p260_p5, %p162_p6 }
  0x60   : > { %s4952_s0 = scalar_select %p3765_p11, 1, 0 }
  0x61   : > { %s4954_s12 = scalar_select %p3774_p1, 1, 0 }
  0x62   : > { %4953 = sst [smem:[#allocation38_spill]] %s4952_s0  ;;  %p3785_p4 = pnand %p2514_p8, %p325_p10 }
  0x63   : > { %4955 = sst [smem:[#allocation39_spill]] %s4954_s12  ;;  %s3493_s18 = smov [#allocation15]  }
  0x64   : > { %s4956_s14 = scalar_select %p3781_p12, 1, 0 }
  0x65   : > { %p2832_p3 = pneg %p3785_p4  ;;  %s340_s24 = sshll.u32 %s3493_s18, 4  ;;  %s341_s24 = int_to_ptr.vmem [resolvable:$true] %s340_s24 }
  0x66   : > { %4957 = sst [smem:[#allocation40_spill]] %s4956_s14  ;;  %s3230_s13 = scalar_lea.vmem %s341_s24, 2048 }
  0x67   : > { %p2833_p9 = pnand %p2832_p3, %p4864_p0  ;;  %p3231_p1 = scmp.ne.s32.totalorder %s341_s24, %s3230_s13 }
  0x68   : > { %p3238_p5 = scmp.lt.s32.totalorder %s341_s24, %s341_s24  ;;  %p3239_p2 = scmp.lt.s32.totalorder %s3230_s13, %s3230_s13 }
  0x69   : > { %p3221_p13 = pneg %p2833_p9 }
  0x6a   : > { %p3240_p12 = por %p3239_p2, %p3238_p5 }
  0x6b   : > { %p3233_p11 = pnand %p3231_p1, %p3221_p13 }
  0x6d   : > { %p3234_p6 = pneg %p3233_p11 }
  0x6f   : > { %p3241_p8 = pnand %p3240_p12, %p3234_p6 }
  0x71   : > { %3244 = shalt.err (!%p3241_p8)
}
  0x72   : > { %s4959_s6 = sld [smem:[#allocation94_spill]]  ;;  %s74_s18 = sor.u32 %s3653_s11, %s3719_s8 }
  0x73   : > { %p75_p13 = scmp.eq.s32.totalorder %s74_s18, 0  ;;  %s77_s13 = sadd.s32 1, %s3465_s22 }
  0x74   : > { %p84_p2 = scmp.ne.s32.totalorder %s3465_s22, %s3461_s21  ;;  %p90_p10 = scmp.ne.s32.totalorder %s3461_s21, %s3457_s20 }
  0x75   : > { %s3807_s4 = scalar_select %p75_p13, %s3465_s22, %s77_s13  }
  0x76   : > { %p4961_p11 = scmp.eq.s32.totalorder %s3485_s27, 0  ;;  %p3813_p12 = por %p4864_p0, %p90_p10 }
  0x77   : > { %4960 = sst [smem:[#allocation41_spill]] %s3807_s4  ;;  %s357_s23 = sand.u32 1, %s3465_s22  }
  0x78   : > { %2835 = dma.hbm_to_vmem [thread:$0]  (!%p2833_p9), %s4959_s6, 2048, %s341_s24, [#allocation16], %s4862_s9, %s4862_s9, %s4863_s5  }
  0x79   : > { %p86_p1 = por %p4961_p11, %p84_p2  ;;  %s2519_s17 = sshll.u32 %s3477_s25, 1 }
  0x7a   : > { %s2517_s15 = sshll.u32 %s357_s23, 6  ;;  %s2626_s14 = sshll.u32 %s3481_s26, 4 }
  0x7b   : > { %s368_s24 = sadd.s32 %s2626_s14, %s2519_s17  ;;  %s361_s11 = scalar_lea.vmem [#allocation6], %s2517_s15 }
  0x7c   : > { %s371_s8 = sshll.u32 %s361_s11, 4  ;;  %s2521_s18 = sshll.u32 %s368_s24, 7  ;;  %s372_s8 = int_to_ptr.vmem [resolvable:$true] %s371_s8 }
  0x7d   : > { %s4963_s1 = sld [smem:[#allocation89_spill]]  ;;  %p4964_p3 = scmp.lt.s32.totalorder %s3485_s27, 8 }
  0x7e   : > { %s358_s6 = scalar_lea.sflag [#allocation7], %s357_s23  ;;  %s3258_s4 = scalar_lea.vmem %s372_s8, 1024 }
  0x7f   : > { %p3825_p9 = pnand %p4964_p3, %p86_p1  ;;  %p3259_p5 = scmp.ne.s32.totalorder %s372_s8, %s3258_s4 }
  0x80   : > { %s3494_s15 = smov [#allocation6]  }
  0x81   : > { %p3247_p6 = pneg %p3825_p9  ;;  %s3263_s17 = sshll.u32 %s3494_s15, 4  ;;  %s3264_s17 = int_to_ptr.vmem [resolvable:$false] %s3263_s17 }
  0x82   : > { %s3265_s14 = scalar_lea.vmem %s3264_s17, 2048  ;;  %p3266_p2 = scmp.lt.s32.totalorder %s372_s8, %s3264_s17 }
  0x83   : > { %s370_s13 = scalar_lea.hbm %s4963_s1, %s2521_s18  ;;  %p3261_p8 = pnand %p3259_p5, %p3247_p6 }
  0x84   : > { %p3267_p10 = scmp.lt.s32.totalorder %s3265_s14, %s3258_s4 }
  0x85   : > { %p3262_p13 = pneg %p3261_p8 }
  0x86   : > { %p3268_p11 = por %p3267_p10, %p3266_p2 }
  0x88   : > { %p3269_p0 = pnand %p3268_p11, %p3262_p13 }
  0x8a   : > { %3272 = shalt.err (!%p3269_p0)
}
  0x8b   : > { %s3495_s9 = smov 512   ;;  %s3496_s24 = smov 256  }
  0x8c   : > { %s3497_s11 = smov 16   ;;  %s2628_s18 = sshll.u32 %s3477_s25, 7 }
  0x8d   : > { %2839 = dma.hbm_to_vmem [thread:$0]  (!%p3825_p9), %s370_s13, 1024, %s372_s8, %s358_s6, %s3495_s9, %s3496_s24, %s3497_s11  }
  0x8e   : > { %s2630_s20 = sshll.u32 %s3481_s26, 10  ;;  %s4967_s4 = sld [smem:[#allocation91_spill]] }
  0x8f   : > { %s4968_s27 = sld [smem:[#allocation93_spill]]  ;;  %s3286_s16 = scalar_lea.vmem %s3691_s10, 2048 }
  0x90   : > { %p3287_p0 = scmp.ne.s32.totalorder %s3691_s10, %s3286_s16  ;;  %p4969_p1 = pneg %p3671_p7 }
  0x91   : > { %s3498_s0 = smov [#allocation11]  }
  0x92   : > { %p3289_p3 = pnand %p3287_p0, %p4969_p1  ;;  %s3291_s5 = sshll.u32 %s3498_s0, 4  ;;  %s3292_s5 = int_to_ptr.vmem [resolvable:$false] %s3291_s5 }
  0x93   : > { %s3293_s6 = scalar_lea.vmem %s3292_s5, 4096  ;;  %p3294_p9 = scmp.lt.s32.totalorder %s3691_s10, %s3292_s5 }
  0x94   : > { %s412_s14 = scalar_lea.hbm %s4967_s4, %s2628_s18  ;;  %p3290_p6 = pneg %p3289_p3 }
  0x95   : > { %s3841_s12 = scalar_lea.hbm %s4968_s27, %s2630_s20  ;;  %p3295_p5 = scmp.lt.s32.totalorder %s3293_s6, %s3286_s16 }
  0x97   : > { %p3296_p8 = por %p3295_p5, %p3294_p9 }
  0x99   : > { %p3297_p13 = pnand %p3296_p8, %p3290_p6 }
  0x9b   : > { %3300 = shalt.err (!%p3297_p13)
}
  0x9c   : > { %s4970_s1 = smov 8   ;;  %s4971_s22 = smov 128  }
  0x9d   : > { %s4972_s27 = sld [smem:[#allocation34_spill]]  ;;  %s3314_s8 = scalar_lea.vmem %s456_s7, 1024 }
  0x9e   : > { %p3315_p2 = scmp.ne.s32.totalorder %s456_s7, %s3314_s8  ;;  %p4973_p10 = scmp.ne.s32.totalorder %s4950_s3, 0 }
  0x9f   : > { %s3499_s16 = smov [#allocation14]  }
  0xa0   : > { %p4974_p11 = pneg %p4973_p10  ;;  %s3319_s0 = sshll.u32 %s3499_s16, 4  ;;  %s3320_s0 = int_to_ptr.vmem [resolvable:$false] %s3319_s0 }
  0xa1   : > { %s3321_s13 = scalar_lea.vmem %s3320_s0, 2048  ;;  %p3322_p3 = scmp.lt.s32.totalorder %s456_s7, %s3320_s0 }
  0xa2   : > { %p3317_p0 = pnand %p3315_p2, %p4974_p11  ;;  %p3323_p6 = scmp.lt.s32.totalorder %s3321_s13, %s3314_s8 }
  0xa3   : > { %2845 = dma.hbm_to_vmem [thread:$0]  (!%p3671_p7), %s412_s14, 2048, %s3691_s10, %s4972_s27, %s3496_s24, %s4971_s22, %s4970_s1  }
  0xa4   : > { %p3318_p1 = pneg %p3317_p0  ;;  %p3324_p9 = por %p3323_p6, %p3322_p3 }
  0xa6   : > { %p3325_p5 = pnand %p3324_p9, %p3318_p1 }
  0xa8   : > { %3328 = shalt.err (!%p3325_p5)
}
  0xa9   : > { %s4975_s9 = smov 4   ;;  %s4976_s10 = smov 64  }
  0xaa   : > { %2851 = dma.hbm_to_vmem [thread:$0]  (!%p4973_p10), %s3841_s12, 1024, %s456_s7, %s3738_s28, %s4976_s10, %s4976_s10, %s4975_s9  }
  0xab   : > { %467 = sbr.rel (%p3785_p4) target bundleno = 1239 (0x4d7), region = 52 }
  0xb0   : > { %s469_s23 = sand.u32 1, %s3461_s21  }
  0xb1   : > { %s2535_s24 = sshll.u32 %s469_s23, 6  ;;  %s470_s11 = scalar_lea.sflag [#allocation7], %s469_s23 }
  0xb2   : > { %s3869_s18 = scalar_lea.vmem [#allocation6], %s2535_s24 }
  0xb3   : > { %3412 = dma.done.wait (%p3813_p12), %s470_s11, 1024  }
  0xb4   : > { %3414 = vsyncadd (%p3813_p12), %s470_s11, 4294966272  ;;  %s4977_s3 = sld [smem:[#allocation38_spill]]  ;;  %s478_s20 = sand.u32 1, %s3754_s2  }
  0xb5   : > { %s480_s28 = sand.u32 1, %s3449_s19   ;;  %s479_s12 = scalar_lea.sflag [#allocation10], %s478_s20 }
  0xb6   : > { %s2536_s7 = sshll.u32 %s480_s28, 7 }
  0xb7   : > { %s3877_s30 = scalar_lea.vmem [#allocation9], %s2536_s7 }
  0xba   : > { %p4978_p7 = scmp.ne.s32.totalorder %s4977_s3, 0 }
  0xbc   : > { %3416 = dma.done.wait (%p4978_p7), %s479_s12, 4096  }
  0xbd   : > { %3418 = vsyncadd (%p4978_p7), %s479_s12, 4294963200  ;;  %s4979_s15 = sld [smem:[#allocation24_spill]]  ;;  %s3887_s14 = scalar_lea.vmem [#allocation11], %s2536_s7 }
  0xbe   : > { %s4980_s17 = sld [smem:[#allocation39_spill]]  ;;  %s497_s5 = scalar_lea.sflag [#allocation13], %s478_s20 }
  0xc3   : > { %s3884_s4 = sand.u32 1, %s4979_s15  }
  0xc4   : > { %s2538_s29 = sshll.u32 %s3884_s4, 7  ;;  %p4981_p4 = scmp.ne.s32.totalorder %s4980_s17, 0 }
  0xc5   : > { %s3889_s6 = scalar_lea.vmem [#allocation12], %s2538_s29 }
  0xc6   : > { %3420 = dma.done.wait (%p4981_p4), %s497_s5, 3072  }
  0xc7   : > { %3422 = vsyncadd (%p4981_p4), %s497_s5, 4294964224  ;;  %s2539_s1 = sshll.u32 %s3884_s4, 6  ;;  %p4982_p12 = scmp.eq.s32.totalorder %s3754_s2, 0 }
  0xc8   : > { %s3896_s22 = scalar_lea.vmem [#allocation14], %s2539_s1 }
  0xc9   : > { %3424 = dma.done.wait (%p4982_p12), [#allocation16], 2048   ;;  %p4983_p8 = pmov %p4982_p12 }
  0xca   : > { %s4984_s27 = sld [smem:[#allocation29_spill]]  ;;  %s3913_s20 = scalar_lea.vmem [#allocation17], %s2538_s29 }
  0xcb   : > { %3426 = vsyncadd (%p4983_p8), [#allocation16], 4294965248  ;;  %s4985_s9 = sld [smem:[#allocation97_spill]] }
  0xcc   : > { %s4986_s11 = sld [smem:[#allocation98_spill]] }
  0xcd   : > { %s4987_s28 = sld [smem:[#allocation28_spill]] }
  0xd0   : > { %s2542_s8 = sshll.u32 %s4984_s27, 4 }
  0xd1   : > { %p588_p13 = scmp.lt.s32.totalorder %s2542_s8, 63 }
  0xd3   : > { %s5135_s8 = smov (!%p588_p13, %s2542_s8), 63  ;;  %p2546_p2 = scmp.ne.s32.totalorder %s4987_s28, 0 }
  0xd4   : > { %s2543_s16 = sshll.u32 %s5135_s8, 3 }
  0xd5   : > { %s3906_s10 = scalar_lea.vmem %s4985_s9, %s2543_s16  ;;  %s3911_s3 = scalar_lea.vmem %s4986_s11, %s2543_s16 }
  0xd6   : > { %603 = sbr.rel (%p2546_p2) target bundleno = 244 (0xf4), region = 80 }
  0xdb   : > { %vm620_vm0 = vcmask 7168   ;;  %v3500_v0 = vmov 0.0   ;;  %v3501_v1 = vmov -inf  }
  0xdc   : > { %604 = vst [vmem:[#allocation2 + $0x30] sm:$0xff] %v3500_v0  ;;  %605 = vst [vmem:[#allocation2] sm:$0xff] %v3500_v0 }
  0xdd   : > { %606 = vst [vmem:[#allocation2 + $0x58] sm:$0xff] %v3500_v0  ;;  %607 = vst [vmem:[#allocation2 + $0x18] sm:$0xff] %v3500_v0 }
  0xde   : > { %608 = vst [vmem:[#allocation2 + $0x50] sm:$0xff] %v3500_v0  ;;  %609 = vst [vmem:[#allocation2 + $0x68] sm:$0xff] %v3500_v0 }
  0xdf   : > { %610 = vst [vmem:[#allocation2 + $0x8] sm:$0xff] %v3500_v0  ;;  %611 = vst [vmem:[#allocation2 + $0x48] sm:$0xff] %v3500_v0 }
  0xe0   : > { %612 = vst [vmem:[#allocation2 + $0x40] sm:$0xff] %v3500_v0  ;;  %613 = vst [vmem:[#allocation2 + $0x20] sm:$0xff] %v3500_v0 }
  0xe1   : > { %614 = vst [vmem:[#allocation2 + $0x10] sm:$0xff] %v3500_v0  ;;  %615 = vst [vmem:[#allocation2 + $0x38] sm:$0xff] %v3500_v0 }
  0xe2   : > { %616 = vst [vmem:[#allocation2 + $0x60] sm:$0xff] %v3500_v0  ;;  %617 = vst [vmem:[#allocation2 + $0x70] sm:$0xff] %v3500_v0 }
  0xe3   : > { %618 = vst [vmem:[#allocation2 + $0x78] sm:$0xff] %v3500_v0  ;;  %619 = vst [vmem:[#allocation2 + $0x28] sm:$0xff] %v3500_v0 }
  0xe4   : > { %621 = vst.msk [vmem:[#allocation3] sm:$0xff] %vm620_vm0, %v3501_v1  ;;  %622 = vst.msk [vmem:[#allocation3 + $0x8] sm:$0xff] %vm620_vm0, %v3501_v1 }
  0xe5   : > { %623 = vst.msk [vmem:[#allocation3 + $0x10] sm:$0xff] %vm620_vm0, %v3501_v1  ;;  %624 = vst.msk [vmem:[#allocation3 + $0x18] sm:$0xff] %vm620_vm0, %v3501_v1 }
  0xe6   : > { %625 = vst.msk [vmem:[#allocation3 + $0x20] sm:$0xff] %vm620_vm0, %v3501_v1  ;;  %626 = vst.msk [vmem:[#allocation3 + $0x28] sm:$0xff] %vm620_vm0, %v3501_v1 }
  0xe7   : > { %627 = vst.msk [vmem:[#allocation3 + $0x30] sm:$0xff] %vm620_vm0, %v3501_v1  ;;  %628 = vst.msk [vmem:[#allocation3 + $0x38] sm:$0xff] %vm620_vm0, %v3501_v1 }
  0xe8   : > { %629 = vst.msk [vmem:[#allocation3 + $0x40] sm:$0xff] %vm620_vm0, %v3501_v1  ;;  %630 = vst.msk [vmem:[#allocation3 + $0x48] sm:$0xff] %vm620_vm0, %v3501_v1 }
  0xe9   : > { %631 = vst.msk [vmem:[#allocation3 + $0x50] sm:$0xff] %vm620_vm0, %v3501_v1  ;;  %632 = vst.msk [vmem:[#allocation3 + $0x58] sm:$0xff] %vm620_vm0, %v3501_v1 }
  0xea   : > { %633 = vst.msk [vmem:[#allocation3 + $0x60] sm:$0xff] %vm620_vm0, %v3501_v1  ;;  %634 = vst.msk [vmem:[#allocation3 + $0x68] sm:$0xff] %vm620_vm0, %v3501_v1 }
  0xeb   : > { %635 = vst.msk [vmem:[#allocation3 + $0x70] sm:$0xff] %vm620_vm0, %v3501_v1  ;;  %636 = vst.msk [vmem:[#allocation3 + $0x78] sm:$0xff] %vm620_vm0, %v3501_v1 }
  0xec   : > { %637 = vst.msk [vmem:[#allocation4] sm:$0xff] %vm620_vm0, %v3500_v0  ;;  %638 = vst.msk [vmem:[#allocation4 + $0x8] sm:$0xff] %vm620_vm0, %v3500_v0 }
  0xed   : > { %639 = vst.msk [vmem:[#allocation4 + $0x10] sm:$0xff] %vm620_vm0, %v3500_v0  ;;  %640 = vst.msk [vmem:[#allocation4 + $0x18] sm:$0xff] %vm620_vm0, %v3500_v0 }
  0xee   : > { %641 = vst.msk [vmem:[#allocation4 + $0x20] sm:$0xff] %vm620_vm0, %v3500_v0  ;;  %642 = vst.msk [vmem:[#allocation4 + $0x28] sm:$0xff] %vm620_vm0, %v3500_v0 }
  0xef   : > { %643 = vst.msk [vmem:[#allocation4 + $0x30] sm:$0xff] %vm620_vm0, %v3500_v0  ;;  %644 = vst.msk [vmem:[#allocation4 + $0x38] sm:$0xff] %vm620_vm0, %v3500_v0 }
  0xf0   : > { %645 = vst.msk [vmem:[#allocation4 + $0x40] sm:$0xff] %vm620_vm0, %v3500_v0  ;;  %646 = vst.msk [vmem:[#allocation4 + $0x48] sm:$0xff] %vm620_vm0, %v3500_v0 }
  0xf1   : > { %647 = vst.msk [vmem:[#allocation4 + $0x50] sm:$0xff] %vm620_vm0, %v3500_v0  ;;  %648 = vst.msk [vmem:[#allocation4 + $0x58] sm:$0xff] %vm620_vm0, %v3500_v0 }
  0xf2   : > { %649 = vst.msk [vmem:[#allocation4 + $0x60] sm:$0xff] %vm620_vm0, %v3500_v0  ;;  %650 = vst.msk [vmem:[#allocation4 + $0x68] sm:$0xff] %vm620_vm0, %v3500_v0 }
  0xf3   : > { %651 = vst.msk [vmem:[#allocation4 + $0x70] sm:$0xff] %vm620_vm0, %v3500_v0  ;;  %652 = vst.msk [vmem:[#allocation4 + $0x78] sm:$0xff] %vm620_vm0, %v3500_v0 }
  0xf4 PF: > { %v2987_v2 = vld [vmem:[%s3887_s14 + $0x74] ss:$8 sps:$4 sm:$0xff]   ;;  %v2989_v3 = vld [vmem:[%s3887_s14 + $0x70] ss:$8 sps:$4 sm:$0xff]   ;;  %v3502_v4 = vmov 0   ;;  %v3011_v19 = vld [vmem:[%s3896_s22] sm:$0xff]  }
  0xf5   : > { %1270 = vmatprep.mubr.bf16.mxu1 %v3502_v4  ;;  %2985 = vset.pattern.permute.xlu0 %v3502_v4  ;;  %v2990_v5 = vld [vmem:[%s3887_s14 + $0x64] ss:$8 sps:$4 sm:$0xff]   ;;  %v2992_v6 = vld [vmem:[%s3887_s14 + $0x60] ss:$8 sps:$4 sm:$0xff]   ;;  %v2993_v7 = vld [vmem:[%s3887_s14 + $0x54] ss:$8 sps:$4 sm:$0xff]  }
  0xf6   : > { %1238 = vmatprep.subr.bf16.mxu1 %v2987_v2  ;;  %2986 = vset.pattern.permute.xlu1 %v3502_v4  ;;  %v2995_v8 = vld [vmem:[%s3887_s14 + $0x50] ss:$8 sps:$4 sm:$0xff]   ;;  %v2996_v9 = vld [vmem:[%s3887_s14 + $0x44] ss:$8 sps:$4 sm:$0xff]   ;;  %v2998_v10 = vld [vmem:[%s3887_s14 + $0x40] ss:$8 sps:$4 sm:$0xff]  }
  0xf7   : > { %1239 = vmatpush1.bf16.msra.mxu1 %v2989_v3  ;;  %v2999_v11 = vld [vmem:[%s3887_s14 + $0x34] ss:$8 sps:$4 sm:$0xff]   ;;  %v3001_v12 = vld [vmem:[%s3887_s14 + $0x30] ss:$8 sps:$4 sm:$0xff]   ;;  %v3002_v13 = vld [vmem:[%s3887_s14 + $0x24] ss:$8 sps:$4 sm:$0xff]  }
  0xf8   : > { %1240 = vmatprep.subr.bf16.mxu1 %v2990_v5  ;;  %v3004_v14 = vld [vmem:[%s3887_s14 + $0x20] ss:$8 sps:$4 sm:$0xff]   ;;  %v3005_v15 = vld [vmem:[%s3887_s14 + $0x14] ss:$8 sps:$4 sm:$0xff]   ;;  %v3007_v16 = vld [vmem:[%s3887_s14 + $0x10] ss:$8 sps:$4 sm:$0xff]  }
  0xf9   : > { %v3008_v17 = vld [vmem:[%s3887_s14 + $0x4] ss:$8 sps:$4 sm:$0xff]   ;;  %v3010_v18 = vld [vmem:[%s3887_s14] ss:$8 sps:$4 sm:$0xff]   ;;  %v3013_v21 = vld [vmem:[%s3896_s22 + $0x10] sm:$0xff]   ;;  %vm1831_vm1 = vcmask 7168  }
  0xfa   : > { %v3012_v20 = vld [vmem:[%s3896_s22 + $0x8] sm:$0xff]   ;;  %v3014_v22 = vld [vmem:[%s3896_s22 + $0x18] sm:$0xff]   ;;  %v3015_v23 = vld [vmem:[%s3896_s22 + $0x20] sm:$0xff]   ;;  %s5098_s2 = sld [smem:[#allocation28_spill]] }
  0xfb   : > { %1241 = vmatpush1.bf16.msra.mxu1 %v2992_v6  ;;  %v3016_v24 = vld [vmem:[%s3896_s22 + $0x28] sm:$0xff]   ;;  %v3017_v25 = vld [vmem:[%s3896_s22 + $0x30] sm:$0xff]   ;;  %v3018_v26 = vld [vmem:[%s3896_s22 + $0x38] sm:$0xff]  }
  0xfc   : > { %1242 = vmatprep.subr.bf16.mxu1 %v2993_v7  ;;  %v3973_v27 = vld [vmem:[%s3869_s18] sm:$0xff]  ;;  %v3976_v28 = vld [vmem:[%s3869_s18 + $0x8] sm:$0xff]  ;;  %v4001_v45 = vld [vmem:[%s3869_s18 + $0x10] sm:$0xff] }
  0xfd   : > { %v661_v29 = vunpack.c.0.s8 %v3973_v27  ;;  %v662_v30 = vunpack.c.0.s8 %v3976_v28  ;;  %v663_v31 = vunpack.c.1.s8 %v3973_v27  ;;  %v664_v32 = vunpack.c.1.s8 %v3976_v28  ;;  %v4004_v46 = vld [vmem:[%s3869_s18 + $0x18] sm:$0xff] }
  0xfe   : > { %v665_v37 = vunpack.c.2.s8 %v3973_v27  ;;  %v666_v38 = vunpack.c.2.s8 %v3976_v28  ;;  %v667_v49 = vunpack.c.3.s8 %v3973_v27  ;;  %v668_v50 = vunpack.c.3.s8 %v3976_v28 }
  0xff   : > { %1243 = vmatpush1.bf16.msra.mxu1 %v2995_v8  ;;  %v3982_v33 = vcvt.s32.f32 %v661_v29  ;;  %v3984_v34 = vcvt.s32.f32 %v662_v30  ;;  %v3986_v35 = vcvt.s32.f32 %v663_v31  ;;  %v3988_v36 = vcvt.s32.f32 %v664_v32 }
 0x100   : > { %1244 = vmatprep.subr.bf16.mxu1 %v2996_v9  ;;  %v3996_v43 = vcvt.s32.f32 %v665_v37  ;;  %v3998_v44 = vcvt.s32.f32 %v666_v38  ;;  %v669_v52 = vunpack.c.0.s8 %v4001_v45  ;;  %v670_v53 = vunpack.c.0.s8 %v4004_v46  ;;  %p2619_p10 = scmp.ne.s32.totalorder %s5098_s2, 1 }
 0x101   : > { %v2563_v39 = vadd.f32 -1.0, %v3982_v33  ;;  %v2564_v40 = vadd.f32 -1.0, %v3984_v34  ;;  %v2565_v41 = vadd.f32 -1.0, %v3986_v35  ;;  %v2566_v42 = vadd.f32 -1.0, %v3988_v36  ;;  %s5099_s15 = sld [smem:[#allocation95_spill]] (!%p2619_p10) }
 0x102   : > { %v2567_v57 = vadd.f32 -1.0, %v3996_v43  ;;  %v2568_v58 = vadd.f32 -1.0, %v3998_v44  ;;  %v4016_v61 = vcvt.s32.f32 %v667_v49  ;;  %v4018_v62 = vcvt.s32.f32 %v668_v50 }
 0x103   : > { %1245 = vmatpush1.bf16.msra.mxu1 %v2998_v10  ;;  %v1078_v47 = vmul.f32 1e+30, %v2563_v39  ;;  %v1079_v48 = vmul.f32 1e+30, %v2564_v40  ;;  %v1080_v55 = vmul.f32 1e+30, %v2565_v41  ;;  %v4022_v1 = vcvt.s32.f32 %v669_v52 }
 0x104   : > { %1246 = vmatprep.subr.bf16.mxu1 %v2999_v11  ;;  %v1081_v56 = vmul.f32 1e+30, %v2566_v42  ;;  %v4024_v2 = vcvt.s32.f32 %v670_v53  ;;  %v1083_v5 = vmul.f32 1e+30, %v2568_v58  ;;  %v671_v6 = vunpack.c.1.s8 %v4001_v45  ;;  %v4057_v40 = vld [vmem:[%s3869_s18 + $0x20] sm:$0xff]  ;;  %v4060_v41 = vld [vmem:[%s3869_s18 + $0x28] sm:$0xff] }
 0x105   : > { %v672_v7 = vunpack.c.1.s8 %v4004_v46  ;;  %v2569_v10 = vadd.f32 -1.0, %v4016_v61  ;;  %v2570_v11 = vadd.f32 -1.0, %v4018_v62  ;;  %v676_v49 = vunpack.c.3.s8 %v4004_v46 }
 0x106   : > { %v677_v52 = vunpack.c.0.s8 %v4057_v40  ;;  %v678_v53 = vunpack.c.0.s8 %v4060_v41 }
 0x107   : > { %1247 = vmatpush1.bf16.msra.mxu1 %v3001_v12 }
 0x108   : > { %1248 = vmatprep.subr.bf16.mxu1 %v3002_v13 }
 0x10b   : > { %1249 = vmatpush1.bf16.msra.mxu1 %v3004_v14  ;;  %v2571_v14 = vadd.f32 -1.0, %v4022_v1 }
 0x10c   : > { %1250 = vmatprep.subr.bf16.mxu1 %v3005_v15  ;;  %v2572_v15 = vadd.f32 -1.0, %v4024_v2 }
 0x10d   : > { %v1086_v29 = vmul.f32 1e+30, %v2571_v14  ;;  %v679_v14 = vunpack.c.1.s8 %v4057_v40 }
 0x10e   : > { %v1087_v30 = vmul.f32 1e+30, %v2572_v15  ;;  %v680_v15 = vunpack.c.1.s8 %v4060_v41 }
 0x10f   : > { %1251 = vmatpush1.bf16.msra.mxu1 %v3007_v16 }
 0x110   : > { %1252 = vmatprep.subr.bf16.mxu1 %v3008_v17  ;;  %v4038_v17 = vcvt.s32.f32 %v671_v6 }
 0x112   : > { %v2573_v32 = vadd.f32 -1.0, %v4038_v17 }
 0x113   : > { %1253 = vmatpush1.bf16.msra.mxu1 %v3010_v18  ;;  %v4040_v18 = vcvt.s32.f32 %v672_v7  ;;  %v4084_v7 = vcvt.s32.f32 %v677_v52 }
 0x115   : > { %4988 = vst [vmem:[#allocation42_spill] sm:$0xff] %v4040_v18  ;;  %v2574_v37 = vadd.f32 -1.0, %v4040_v18  ;;  %4993 = vst [vmem:[#allocation47_spill] sm:$0xff] %v4084_v7 }
 0x116   : > { %1271 = vmatmul.mubr.bf16.vlgmr.msra.gmra.mxu1 %v3011_v19  ;;  %v673_v19 = vunpack.c.2.s8 %v4001_v45 }
 0x117   : > { %1280 = vmatprep.mubr.bf16.mxu1 %v3502_v4 }
 0x118   : > { %v4052_v38 = vcvt.s32.f32 %v673_v19 }
 0x11a   : > { %4989 = vst [vmem:[#allocation43_spill] sm:$0xff] %v4052_v38 }
 0x11e   : > { %1281 = vmatmul.mubr.bf16.gmra.mxu1 %v3012_v20  ;;  %v674_v20 = vunpack.c.2.s8 %v4004_v46 }
 0x11f   : > { %1290 = vmatprep.mubr.bf16.mxu1 %v3502_v4 }
 0x120   : > { %v4054_v39 = vcvt.s32.f32 %v674_v20 }
 0x122   : > { %4990 = vst [vmem:[#allocation44_spill] sm:$0xff] %v4054_v39  ;;  %v2576_v58 = vadd.f32 -1.0, %v4054_v39 }
 0x126   : > { %1291 = vmatmul.mubr.bf16.gmra.mxu1 %v3013_v21 }
 0x127   : > { %1300 = vmatprep.mubr.bf16.mxu1 %v3502_v4 }
 0x12e   : > { %1301 = vmatmul.mubr.bf16.gmra.mxu1 %v3014_v22 }
 0x12f   : > { %1310 = vmatprep.mubr.bf16.mxu1 %v3502_v4 }
 0x136   : > { %1311 = vmatmul.mubr.bf16.gmra.mxu1 %v3015_v23  ;;  %v1084_v23 = vmul.f32 1e+30, %v2569_v10  ;;  %v4086_v10 = vcvt.s32.f32 %v678_v53 }
 0x137   : > { %1320 = vmatprep.mubr.bf16.mxu1 %v3502_v4 }
 0x138   : > { %4994 = vst [vmem:[#allocation48_spill] sm:$0xff] %v4086_v10 }
 0x13e   : > { %1321 = vmatmul.mubr.bf16.gmra.mxu1 %v3016_v24  ;;  %v1085_v24 = vmul.f32 1e+30, %v2570_v11 }
 0x13f   : > { %1330 = vmatprep.mubr.bf16.mxu1 %v3502_v4 }
 0x146   : > { %1331 = vmatmul.mubr.bf16.gmra.mxu1 %v3017_v25 }
 0x147   : > { %1340 = vmatprep.mubr.bf16.mxu1 %v3502_v4  ;;  %v1082_v4 = vmul.f32 1e+30, %v2567_v57  ;;  %v2575_v57 = vadd.f32 -1.0, %v4052_v38 }
 0x14e   : > { %1341 = vmatmul.mubr.bf16.gmra.mxu1 %v3018_v26 }
 0x1d6   : > { %v1272_v51 = vpop.f32.mrf.mxu1 }
 0x1d7   : > { %v4012_v59 = vadd.f32 %v1272_v51, %v1078_v47 }
 0x1d8   : > { %v1274_v54 = vpop.f32.mrf.mxu1 }
 0x1d9   : > { %v4014_v60 = vadd.f32 %v1274_v54, %v1079_v48  ;;  %v675_v48 = vunpack.c.3.s8 %v4001_v45 }
 0x1da   : > { %v1276_v63 = vpop.f32.mrf.mxu1 }
 0x1db   : > { %v1367_v0 = vmax.f32 %v4012_v59, %v4014_v60  ;;  %v4028_v8 = vadd.f32 %v1276_v63, %v1080_v55  ;;  %v1088_v55 = vmul.f32 1e+30, %v2573_v32  ;;  %v4102_v32 = vcvt.s32.f32 %v680_v15 }
 0x1dc   : > { %v1278_v3 = vpop.f32.mrf.mxu1 }
 0x1dd   : > { %v4030_v9 = vadd.f32 %v1278_v3, %v1081_v56  ;;  %1368 = vmax.xlane.f32.xlu0 %v1367_v0  ;;  %v1089_v56 = vmul.f32 1e+30, %v2574_v37  ;;  %v4078_v3 = vcvt.s32.f32 %v675_v48  ;;  %4996 = vst [vmem:[#allocation50_spill] sm:$0xff] %v4102_v32  ;;  %v681_v37 = vunpack.c.2.s8 %v4057_v40 }
 0x1de   : > { %v1282_v12 = vpop.f32.mrf.mxu1  ;;  %v682_v48 = vunpack.c.2.s8 %v4060_v41 }
 0x1df   : > { %v1370_v13 = vmax.f32 %v4028_v8, %v4030_v9  ;;  %v4044_v21 = vadd.f32 %v1282_v12, %v1082_v4  ;;  %4991 = vst [vmem:[#allocation45_spill] sm:$0xff] %v4078_v3  ;;  %v4080_v4 = vcvt.s32.f32 %v676_v49  ;;  %v1090_v12 = vmul.f32 1e+30, %v2575_v57 }
 0x1e0   : > { %v1284_v16 = vpop.f32.mrf.mxu1  ;;  %v2577_v20 = vadd.f32 -1.0, %v4078_v3 }
 0x1e1   : > { %v4046_v22 = vadd.f32 %v1284_v16, %v1083_v5  ;;  %1371 = vmax.xlane.f32.xlu0 %v1370_v13  ;;  %4992 = vst [vmem:[#allocation46_spill] sm:$0xff] %v4080_v4  ;;  %v1091_v13 = vmul.f32 1e+30, %v2576_v58 }
 0x1e2   : > { %v1286_v25 = vpop.f32.mrf.mxu1 }
 0x1e3   : > { %v1373_v26 = vmax.f32 %v4044_v21, %v4046_v22  ;;  %v4062_v42 = vadd.f32 %v1286_v25, %v1084_v23  ;;  %v2578_v23 = vadd.f32 -1.0, %v4080_v4 }
 0x1e4   : > { %v1288_v31 = vpop.f32.mrf.mxu1 }
 0x1e5   : > { %v4064_v47 = vadd.f32 %v1288_v31, %v1085_v24  ;;  %1374 = vmax.xlane.f32.xlu1 %v1373_v26  ;;  %v2579_v26 = vadd.f32 -1.0, %v4084_v7  ;;  %v4100_v31 = vcvt.s32.f32 %v679_v14  ;;  %v1093_v52 = vmul.f32 1e+30, %v2578_v23 }
 0x1e6   : > { %v1292_v50 = vpop.f32.mrf.mxu1  ;;  %v684_v23 = vunpack.c.3.s8 %v4060_v41 }
 0x1e7   : > { %v1376_v51 = vmax.f32 %v4062_v42, %v4064_v47  ;;  %v4074_v63 = vadd.f32 %v1292_v50, %v1086_v29  ;;  %v2580_v29 = vadd.f32 -1.0, %v4086_v10  ;;  %4995 = vst [vmem:[#allocation49_spill] sm:$0xff] %v4100_v31  ;;  %v2581_v58 = vadd.f32 -1.0, %v4100_v31 }
 0x1e8   : > { %v1294_v54 = vpop.f32.mrf.mxu1 }
 0x1e9   : > { %v4076_v0 = vadd.f32 %v1294_v54, %v1087_v30  ;;  %1377 = vmax.xlane.f32.xlu1 %v1376_v51  ;;  %v1092_v51 = vmul.f32 1e+30, %v2577_v20  ;;  %v683_v20 = vunpack.c.3.s8 %v4057_v40 }
 0x1ea   : > { %v1296_v5 = vpop.f32.mrf.mxu1 }
 0x1eb   : > { %v1379_v6 = vmax.f32 %v4074_v63, %v4076_v0  ;;  %v4090_v16 = vadd.f32 %v1296_v5, %v1088_v55  ;;  %v1094_v55 = vmul.f32 1e+30, %v2579_v26  ;;  %v2582_v5 = vadd.f32 -1.0, %v4102_v32 }
 0x1ec   : > { %v1298_v11 = vpop.f32.mrf.mxu1  ;;  %v4142_v32 = vcvt.s32.f32 %v684_v23 }
 0x1ed   : > { %v4092_v19 = vadd.f32 %v1298_v11, %v1089_v56  ;;  %1380 = vmax.xlane.f32.xlu0 %v1379_v6  ;;  %v1095_v56 = vmul.f32 1e+30, %v2580_v29  ;;  %v4114_v6 = vcvt.s32.f32 %v681_v37  ;;  %v4116_v11 = vcvt.s32.f32 %v682_v48 }
 0x1ee   : > { %v1302_v24 = vpop.f32.mrf.mxu1  ;;  %v1096_v37 = vmul.f32 1e+30, %v2581_v58  ;;  %v1097_v48 = vmul.f32 1e+30, %v2582_v5  ;;  %5000 = vst [vmem:[#allocation54_spill] sm:$0xff] %v4142_v32 }
 0x1ef   : > { %v1382_v25 = vmax.f32 %v4090_v16, %v4092_v19  ;;  %v4106_v49 = vadd.f32 %v1302_v24, %v1090_v12  ;;  %4997 = vst [vmem:[#allocation51_spill] sm:$0xff] %v4114_v6  ;;  %4998 = vst [vmem:[#allocation52_spill] sm:$0xff] %v4116_v11  ;;  %v4119_v12 = vld [vmem:[%s3869_s18 + $0x30] sm:$0xff] }
 0x1f0   : > { %v1304_v30 = vpop.f32.mrf.mxu1  ;;  %v685_v26 = vunpack.c.0.s8 %v4119_v12 }
 0x1f1   : > { %v4108_v50 = vadd.f32 %v1304_v30, %v1091_v13  ;;  %1383 = vmax.xlane.f32.xlu1 %v1382_v25  ;;  %v4122_v13 = vld [vmem:[%s3869_s18 + $0x38] sm:$0xff]  ;;  %s4541_s18 = sld [smem:[#allocation5]] (!%p2619_p10) }
 0x1f2   : > { %v1306_v53 = vpop.f32.mrf.mxu1  ;;  %v686_v29 = vunpack.c.0.s8 %v4122_v13  ;;  %v4146_v7 = vcvt.s32.f32 %v685_v26 }
 0x1f3   : > { %v1385_v54 = vmax.f32 %v4106_v49, %v4108_v50  ;;  %v4124_v14 = vadd.f32 %v1306_v53, %v1092_v51  ;;  %v2583_v51 = vadd.f32 -1.0, %v4114_v6 }
 0x1f4   : > { %v1308_v57 = vpop.f32.mrf.mxu1  ;;  %5001 = vst [vmem:[#allocation55_spill] sm:$0xff] %v4146_v7  ;;  %v4148_v58 = vcvt.s32.f32 %v686_v29 }
 0x1f5   : > { %v4126_v15 = vadd.f32 %v1308_v57, %v1093_v52  ;;  %1386 = vmax.xlane.f32.xlu0 %v1385_v54  ;;  %v2584_v52 = vadd.f32 -1.0, %v4116_v11  ;;  %v4140_v57 = vcvt.s32.f32 %v683_v20  ;;  %v1098_v6 = vmul.f32 1e+30, %v2583_v51 }
 0x1f6   : > { %v1312_v24 = vpop.f32.mrf.mxu1  ;;  %5002 = vst [vmem:[#allocation56_spill] sm:$0xff] %v4148_v58  ;;  %v2588_v51 = vadd.f32 -1.0, %v4148_v58 }
 0x1f7   : > { %v1388_v25 = vmax.f32 %v4124_v14, %v4126_v15  ;;  %v4136_v53 = vadd.f32 %v1312_v24, %v1094_v55  ;;  %4999 = vst [vmem:[#allocation53_spill] sm:$0xff] %v4140_v57  ;;  %v1099_v11 = vmul.f32 1e+30, %v2584_v52  ;;  %v687_v55 = vunpack.c.1.s8 %v4119_v12  ;;  %s1869_s7 = sadd.f32 (!%p2619_p10), 1.0, %s4541_s18 }
 0x1f8   : > { %v1314_v30 = vpop.f32.mrf.mxu1  ;;  %v2585_v23 = vadd.f32 -1.0, %v4140_v57 }
 0x1f9   : > { %v4138_v54 = vadd.f32 %v1314_v30, %v1095_v56  ;;  %1389 = vmax.xlane.f32.xlu1 %v1388_v25  ;;  %v688_v56 = vunpack.c.1.s8 %v4122_v13  ;;  %v2586_v25 = vadd.f32 -1.0, %v4142_v32  ;;  %v2587_v30 = vadd.f32 -1.0, %v4146_v7 }
 0x1fa   : > { %v1316_v31 = vpop.f32.mrf.mxu1  ;;  %v4162_v4 = vcvt.s32.f32 %v687_v55  ;;  %v1100_v32 = vmul.f32 1e+30, %v2585_v23  ;;  %v1103_v55 = vmul.f32 1e+30, %v2588_v51  ;;  %v691_v23 = vunpack.c.3.s8 %v4119_v12 }
 0x1fb   : > { %v1391_v10 = vmax.f32 %v4136_v53, %v4138_v54  ;;  %v4152_v24 = vadd.f32 %v1316_v31, %v1096_v37  ;;  %v4164_v31 = vcvt.s32.f32 %v688_v56  ;;  %v689_v37 = vunpack.c.2.s8 %v4119_v12 }
 0x1fc   : > { %v1318_v5 = vpop.f32.mrf.mxu1  ;;  %5003 = vst [vmem:[#allocation57_spill] sm:$0xff] %v4162_v4  ;;  %v1101_v57 = vmul.f32 1e+30, %v2586_v25  ;;  %v1102_v7 = vmul.f32 1e+30, %v2587_v30  ;;  %v2589_v56 = vadd.f32 -1.0, %v4162_v4  ;;  %v692_v25 = vunpack.c.3.s8 %v4122_v13 }
 0x1fd   : > { %v4154_v20 = vadd.f32 %v1318_v5, %v1097_v48  ;;  %1392 = vmax.xlane.f32.xlu0 %v1391_v10  ;;  %5004 = vst [vmem:[#allocation58_spill] sm:$0xff] %v4164_v31  ;;  %v690_v10 = vunpack.c.2.s8 %v4122_v13  ;;  %v2590_v38 = vadd.f32 -1.0, %v4164_v31  ;;  %v4176_v18 = vcvt.s32.f32 %v689_v37 }
 0x1fe   : > { %v1322_v26 = vpop.f32.mrf.mxu1 }
 0x1ff   : > { %v1394_v29 = vmax.f32 %v4152_v24, %v4154_v20  ;;  %v4168_v48 = vadd.f32 %v1322_v26, %v1098_v6  ;;  %5005 = vst [vmem:[#allocation59_spill] sm:$0xff] %v4176_v18  ;;  %v4178_v6 = vcvt.s32.f32 %v690_v10  ;;  %v1105_v31 = vmul.f32 1e+30, %v2590_v38 }
 0x200   : > { %v1324_v52 = vpop.f32.mrf.mxu1  ;;  %v2591_v37 = vadd.f32 -1.0, %v4176_v18 }
 0x201   : > { %v4170_v5 = vadd.f32 %v1324_v52, %v1099_v11  ;;  %1395 = vmax.xlane.f32.xlu1 %v1394_v29  ;;  %v1104_v52 = vmul.f32 1e+30, %v2589_v56  ;;  %v2592_v10 = vadd.f32 -1.0, %v4178_v6 }
 0x202   : > { %v1326_v3 = vpop.f32.mrf.mxu1  ;;  %v1106_v56 = vmul.f32 1e+30, %v2591_v37 }
 0x203   : > { %v1397_v58 = vmax.f32 %v4168_v48, %v4170_v5  ;;  %v4180_v11 = vadd.f32 %v1326_v3, %v1100_v32  ;;  %v4194_v32 = vcvt.s32.f32 %v691_v23  ;;  %v1107_v38 = vmul.f32 1e+30, %v2592_v10 }
 0x204   : > { %v1328_v39 = vpop.f32.mrf.mxu1 }
 0x205   : > { %5006 = vst [vmem:[#allocation60_spill] sm:$0xff] %v4180_v11  ;;  %v4182_v26 = vadd.f32 %v1328_v39, %v1101_v57  ;;  %1398 = vmax.xlane.f32.xlu0 %v1397_v58  ;;  %v4196_v57 = vcvt.s32.f32 %v692_v25 }
 0x206   : > { %v1332_v29 = vpop.f32.mrf.mxu1 }
 0x207   : > { %5007 = vst [vmem:[#allocation61_spill] sm:$0xff] %v4182_v26  ;;  %v1400_v30 = vmax.f32 %v4180_v11, %v4182_v26  ;;  %v4190_v3 = vadd.f32 %v1332_v29, %v1102_v7  ;;  %v2593_v7 = vadd.f32 -1.0, %v4194_v32 }
 0x208   : > { %v1334_v51 = vpop.f32.mrf.mxu1 }
 0x209   : > { %v4192_v39 = vadd.f32 %v1334_v51, %v1103_v55  ;;  %1401 = vmax.xlane.f32.xlu1 %v1400_v30  ;;  %v2594_v55 = vadd.f32 -1.0, %v4196_v57 }
 0x20a   : > { %v1336_v58 = vpop.f32.mrf.mxu1 }
 0x20b   : > { %v1403_v4 = vmax.f32 %v4190_v3, %v4192_v39  ;;  %v4200_v11 = vadd.f32 %v1336_v58, %v1104_v52 }
 0x20c   : > { %v1338_v26 = vpop.f32.mrf.mxu1 }
 0x20d   : > { %v4202_v18 = vadd.f32 %v1338_v26, %v1105_v31  ;;  %1404 = vmax.xlane.f32.xlu0 %v1403_v4  ;;  %v1108_v31 = vmul.f32 1e+30, %v2593_v7  ;;  %v1109_v4 = vmul.f32 1e+30, %v2594_v55  ;;  %v3020_v7 = vld [vmem:[%s3877_s30 + $0x38] sm:$0xff]   ;;  %v3021_v55 = vld [vmem:[%s3877_s30 + $0x70] sm:$0xff]  }
 0x20e   : > { %v1342_v23 = vpop.f32.mrf.mxu1 }
 0x20f   : > { %v1406_v25 = vmax.f32 %v4200_v11, %v4202_v18  ;;  %v4208_v30 = vadd.f32 %v1342_v23, %v1106_v56  ;;  %v3022_v23 = vld [vmem:[%s3877_s30 + $0x30] sm:$0xff]  }
 0x210   : > { %v1344_v29 = vpop.f32.mrf.mxu1 }
 0x211   : > { %v4210_v51 = vadd.f32 %v1344_v29, %v1107_v38  ;;  %1407 = vmax.xlane.f32.xlu1 %v1406_v25  ;;  %v3019_v38 = vld [vmem:[%s3877_s30 + $0x78] sm:$0xff]   ;;  %v3023_v25 = vld [vmem:[%s3877_s30 + $0x68] sm:$0xff]  }
 0x212   : > { %v1346_v26 = vpop.f32.mrf.mxu1  ;;  %2632 = vmatprep.subr.bf16.mxu0 %v3019_v38  ;;  %v3024_v29 = vld [vmem:[%s3877_s30 + $0x28] sm:$0xff]   ;;  %v3030_v38 = vld [vmem:[%s3877_s30 + $0x10] sm:$0xff]  }
 0x213   : > { %v1409_v52 = vmax.f32 %v4208_v30, %v4210_v51  ;;  %v4214_v10 = vadd.f32 %v1346_v26, %v1108_v31  ;;  %2633 = vmatpush3.bf16.msra.mxu0 %v3020_v7  ;;  %v3025_v31 = vld [vmem:[%s3877_s30 + $0x60] sm:$0xff]   ;;  %v3027_v26 = vld [vmem:[%s3877_s30 + $0x58] sm:$0xff]   ;;  %v3031_v7 = vld [vmem:[%s3877_s30 + $0x48] sm:$0xff]  }
 0x214   : > { %v1348_v37 = vpop.f32.mrf.mxu1  ;;  %2634 = vmatprep.subr.bf16.mxu0 %v3021_v55  ;;  %v3032_v55 = vld [vmem:[%s3877_s30 + $0x8] sm:$0xff]  }
 0x215   : > { %v4216_v58 = vadd.f32 %v1348_v37, %v1109_v4  ;;  %1410 = vmax.xlane.f32.xlu0 %v1409_v52  ;;  %v3026_v4 = vld [vmem:[%s3877_s30 + $0x20] sm:$0xff]   ;;  %v3028_v52 = vld [vmem:[%s3877_s30 + $0x18] sm:$0xff]   ;;  %v3029_v37 = vld [vmem:[%s3877_s30 + $0x50] sm:$0xff]  }
 0x217   : > { %v1412_v56 = vmax.f32 %v4214_v10, %v4216_v58  ;;  %2635 = vmatpush3.bf16.msra.mxu0 %v3022_v23  ;;  %v3033_v23 = vld [vmem:[%s3877_s30 + $0x40] sm:$0xff]  }
 0x218   : > { %2636 = vmatprep.subr.bf16.mxu0 %v3023_v25  ;;  %v3034_v25 = vld [vmem:[%s3877_s30] sm:$0xff]  }
 0x219   : > { %1413 = vmax.xlane.f32.xlu1 %v1412_v56  ;;  %v726_v56 = vunpack.c.l.s8.bf16 %v3976_v28 }
 0x21b   : > { %2637 = vmatpush3.bf16.msra.mxu0 %v3024_v29  ;;  %917 = vmatprep.mubr.bf16.mxu0 %v726_v56  ;;  %v725_v29 = vunpack.c.l.s8.bf16 %v3973_v27  ;;  %v731_v56 = vunpack.c.h.s8.bf16 %v4001_v45 }
 0x21c   : > { %2638 = vmatprep.subr.bf16.mxu0 %v3025_v31  ;;  %v728_v31 = vunpack.c.h.s8.bf16 %v3976_v28  ;;  %v733_v28 = vunpack.c.l.s8.bf16 %v4057_v40 }
 0x21f   : > { %2639 = vmatpush3.bf16.msra.mxu0 %v3026_v4  ;;  %v727_v4 = vunpack.c.h.s8.bf16 %v3973_v27  ;;  %v736_v27 = vunpack.c.h.s8.bf16 %v4060_v41 }
 0x220   : > { %2640 = vmatprep.subr.bf16.mxu0 %v3027_v26  ;;  %v730_v26 = vunpack.c.l.s8.bf16 %v4004_v46 }
 0x223   : > { %2641 = vmatpush3.bf16.msra.mxu0 %v3028_v52  ;;  %v729_v52 = vunpack.c.l.s8.bf16 %v4001_v45  ;;  %v4253_v45 = vld [vmem:[#allocation3 + $0x8] sm:$0xff] }
 0x224   : > { %2642 = vmatprep.subr.bf16.mxu0 %v3029_v37  ;;  %v732_v37 = vunpack.c.h.s8.bf16 %v4004_v46 }
 0x227   : > { %2643 = vmatpush3.bf16.msra.mxu0 %v3030_v38  ;;  %v734_v38 = vunpack.c.l.s8.bf16 %v4060_v41 }
 0x228   : > { %2644 = vmatprep.subr.bf16.mxu0 %v3031_v7  ;;  %v735_v7 = vunpack.c.h.s8.bf16 %v4057_v40  ;;  %v738_v40 = vunpack.c.l.s8.bf16 %v4122_v13 }
 0x22b   : > { %2645 = vmatpush3.bf16.msra.mxu0 %v3032_v55  ;;  %v4248_v55 = vld [vmem:[#allocation3] sm:$0xff] }
 0x22c   : > { %2646 = vmatprep.subr.bf16.mxu0 %v3033_v23 }
 0x22f   : > { %2647 = vmatpush3.bf16.msra.mxu0 %v3034_v25  ;;  %v4327_v25 = vld [vmem:[#allocation3 + $0x40] sm:$0xff] }
 0x230   : > { %5019 = vst [vmem:[#allocation73_spill] sm:$0xff] %v4327_v25 }
 0x232   : > { %918 = vmatmul.mubr.bf16.vlgmr.msra.gmra.mxu0 %v725_v29 }
 0x233   : > { %925 = vmatprep.mubr.bf16.mxu0 %v728_v31  ;;  %v737_v31 = vunpack.c.l.s8.bf16 %v4119_v12 }
 0x23a   : > { %926 = vmatmul.mubr.bf16.gmra.mxu0 %v727_v4  ;;  %v4265_v4 = vld [vmem:[#allocation3 + $0x10] sm:$0xff] }
 0x23b   : > { %933 = vmatprep.mubr.bf16.mxu0 %v730_v26 }
 0x242   : > { %934 = vmatmul.mubr.bf16.gmra.mxu0 %v729_v52 }
 0x243   : > { %941 = vmatprep.mubr.bf16.mxu0 %v732_v37 }
 0x24a   : > { %942 = vmatmul.mubr.bf16.gmra.mxu0 %v731_v56  ;;  %v4275_v56 = vld [vmem:[#allocation3 + $0x18] sm:$0xff] }
 0x24b   : > { %949 = vmatprep.mubr.bf16.mxu0 %v734_v38  ;;  %5009 = vst [vmem:[#allocation63_spill] sm:$0xff] %v4275_v56  ;;  %v4317_v38 = vld [vmem:[#allocation3 + $0x38] sm:$0xff] }
 0x24c   : > { %5017 = vst [vmem:[#allocation71_spill] sm:$0xff] %v4317_v38 }
 0x252   : > { %950 = vmatmul.mubr.bf16.gmra.mxu0 %v733_v28 }
 0x253   : > { %957 = vmatprep.mubr.bf16.mxu0 %v736_v27  ;;  %v740_v27 = vunpack.c.h.s8.bf16 %v4122_v13 }
 0x25a   : > { %958 = vmatmul.mubr.bf16.gmra.mxu0 %v735_v7 }
 0x25b   : > { %965 = vmatprep.mubr.bf16.mxu0 %v738_v40  ;;  %v4307_v40 = vld [vmem:[#allocation3 + $0x30] sm:$0xff] }
 0x25c   : > { %5015 = vst [vmem:[#allocation69_spill] sm:$0xff] %v4307_v40 }
 0x262   : > { %966 = vmatmul.mubr.bf16.gmra.mxu0 %v737_v31 }
 0x263   : > { %973 = vmatprep.mubr.bf16.mxu0 %v740_v27 }
 0x266   : > { %v1369_v46 = vpop.xlane.xlu0 %1368 }
 0x267   : > { %v4251_v23 = vmax.f32 %v4248_v55, %v1369_v46  ;;  %v739_v46 = vunpack.c.h.s8.bf16 %v4119_v12 }
 0x269   : > { %1848 = vst.msk [vmem:[#allocation3] sm:$0xff] %vm1831_vm1, %v4251_v23  ;;  %1433 = vperm.xlu0 %2985, %v4251_v23  }
 0x26a   : > { %v1372_v41 = vpop.xlane.xlu0 %1371  ;;  %974 = vmatmul.mubr.bf16.gmra.mxu0 %v739_v46 }
 0x26b   : > { %v4262_v29 = vmax.f32 %v4253_v45, %v1372_v41  ;;  %v4287_v41 = vld [vmem:[#allocation3 + $0x20] sm:$0xff] }
 0x26c   : > { %5011 = vst [vmem:[#allocation65_spill] sm:$0xff] %v4287_v41 }
 0x26d   : > { %1849 = vst.msk [vmem:[#allocation3 + $0x8] sm:$0xff] %vm1831_vm1, %v4262_v29  ;;  %1438 = vperm.xlu1 %2986, %v4262_v29  }
 0x26e   : > { %v1375_v52 = vpop.xlane.xlu1 %1374 }
 0x26f   : > { %v4273_v37 = vmax.f32 %v4265_v4, %v1375_v52  ;;  %v4297_v52 = vld [vmem:[#allocation3 + $0x28] sm:$0xff] }
 0x270   : > { %5013 = vst [vmem:[#allocation67_spill] sm:$0xff] %v4297_v52 }
 0x271   : > { %5008 = vst [vmem:[#allocation62_spill] sm:$0xff] %v4273_v37  ;;  %1850 = vst.msk [vmem:[#allocation3 + $0x10] sm:$0xff] %vm1831_vm1, %v4273_v37  ;;  %1443 = vperm.xlu1 %2986, %v4273_v37  }
 0x272   : > { %v1378_v28 = vpop.xlane.xlu1 %1377 }
 0x273   : > { %v4284_v7 = vmax.f32 %v4275_v56, %v1378_v28 }
 0x275   : > { %5010 = vst [vmem:[#allocation64_spill] sm:$0xff] %v4284_v7  ;;  %1851 = vst.msk [vmem:[#allocation3 + $0x18] sm:$0xff] %vm1831_vm1, %v4284_v7  ;;  %1448 = vperm.xlu1 %2986, %v4284_v7  }
 0x276   : > { %v1381_v31 = vpop.xlane.xlu0 %1380 }
 0x277   : > { %v4295_v13 = vmax.f32 %v4287_v41, %v1381_v31 }
 0x279   : > { %5012 = vst [vmem:[#allocation66_spill] sm:$0xff] %v4295_v13  ;;  %1852 = vst.msk [vmem:[#allocation3 + $0x20] sm:$0xff] %vm1831_vm1, %v4295_v13  ;;  %1453 = vperm.xlu1 %2986, %v4295_v13  }
 0x27a   : > { %v1384_v28 = vpop.xlane.xlu1 %1383 }
 0x27b   : > { %v4305_v27 = vmax.f32 %v4297_v52, %v1384_v28 }
 0x27d   : > { %5014 = vst [vmem:[#allocation68_spill] sm:$0xff] %v4305_v27  ;;  %1853 = vst.msk [vmem:[#allocation3 + $0x28] sm:$0xff] %vm1831_vm1, %v4305_v27  ;;  %1458 = vperm.xlu1 %2986, %v4305_v27   ;;  %v4337_v27 = vld [vmem:[#allocation3 + $0x48] sm:$0xff] }
 0x27e   : > { %v1387_v31 = vpop.xlane.xlu0 %1386  ;;  %5021 = vst [vmem:[#allocation75_spill] sm:$0xff] %v4337_v27 }
 0x27f   : > { %v4315_v12 = vmax.f32 %v4307_v40, %v1387_v31 }
 0x281   : > { %5016 = vst [vmem:[#allocation70_spill] sm:$0xff] %v4315_v12  ;;  %1854 = vst.msk [vmem:[#allocation3 + $0x30] sm:$0xff] %vm1831_vm1, %v4315_v12  ;;  %1463 = vperm.xlu1 %2986, %v4315_v12   ;;  %v4347_v12 = vld [vmem:[#allocation3 + $0x50] sm:$0xff] }
 0x282   : > { %v1390_v46 = vpop.xlane.xlu1 %1389  ;;  %5023 = vst [vmem:[#allocation77_spill] sm:$0xff] %v4347_v12 }
 0x283   : > { %v4325_v26 = vmax.f32 %v4317_v38, %v1390_v46 }
 0x285   : > { %5018 = vst [vmem:[#allocation72_spill] sm:$0xff] %v4325_v26  ;;  %1855 = vst.msk [vmem:[#allocation3 + $0x38] sm:$0xff] %vm1831_vm1, %v4325_v26  ;;  %1468 = vperm.xlu1 %2986, %v4325_v26   ;;  %v4357_v26 = vld [vmem:[#allocation3 + $0x58] sm:$0xff] }
 0x286   : > { %v1393_v28 = vpop.xlane.xlu0 %1392  ;;  %5025 = vst [vmem:[#allocation79_spill] sm:$0xff] %v4357_v26 }
 0x287   : > { %v4335_v40 = vmax.f32 %v4327_v25, %v1393_v28 }
 0x289   : > { %5020 = vst [vmem:[#allocation74_spill] sm:$0xff] %v4335_v40  ;;  %1856 = vst.msk [vmem:[#allocation3 + $0x40] sm:$0xff] %vm1831_vm1, %v4335_v40  ;;  %1473 = vperm.xlu1 %2986, %v4335_v40   ;;  %v4367_v40 = vld [vmem:[#allocation3 + $0x60] sm:$0xff] }
 0x28a   : > { %v1396_v31 = vpop.xlane.xlu1 %1395  ;;  %5027 = vst [vmem:[#allocation81_spill] sm:$0xff] %v4367_v40 }
 0x28b   : > { %v4345_v38 = vmax.f32 %v4337_v27, %v1396_v31 }
 0x28d   : > { %5022 = vst [vmem:[#allocation76_spill] sm:$0xff] %v4345_v38  ;;  %1857 = vst.msk [vmem:[#allocation3 + $0x48] sm:$0xff] %vm1831_vm1, %v4345_v38  ;;  %1478 = vperm.xlu0 %2985, %v4345_v38   ;;  %v4377_v38 = vld [vmem:[#allocation3 + $0x68] sm:$0xff] }
 0x28e   : > { %v1399_v46 = vpop.xlane.xlu0 %1398  ;;  %5029 = vst [vmem:[#allocation83_spill] sm:$0xff] %v4377_v38 }
 0x28f   : > { %v4355_v25 = vmax.f32 %v4347_v12, %v1399_v46 }
 0x291   : > { %5024 = vst [vmem:[#allocation78_spill] sm:$0xff] %v4355_v25  ;;  %1858 = vst.msk [vmem:[#allocation3 + $0x50] sm:$0xff] %vm1831_vm1, %v4355_v25  ;;  %1483 = vperm.xlu1 %2986, %v4355_v25   ;;  %v4387_v25 = vld [vmem:[#allocation3 + $0x70] sm:$0xff] }
 0x292   : > { %v1402_v28 = vpop.xlane.xlu1 %1401  ;;  %5031 = vst [vmem:[#allocation85_spill] sm:$0xff] %v4387_v25 }
 0x293   : > { %v4365_v27 = vmax.f32 %v4357_v26, %v1402_v28 }
 0x295   : > { %5026 = vst [vmem:[#allocation80_spill] sm:$0xff] %v4365_v27  ;;  %1859 = vst.msk [vmem:[#allocation3 + $0x58] sm:$0xff] %vm1831_vm1, %v4365_v27  ;;  %1488 = vperm.xlu0 %2985, %v4365_v27   ;;  %v4397_v27 = vld [vmem:[#allocation3 + $0x78] sm:$0xff] }
 0x296   : > { %v1405_v31 = vpop.xlane.xlu0 %1404  ;;  %5033 = vst [vmem:[#allocation87_spill] sm:$0xff] %v4397_v27 }
 0x297   : > { %v4375_v12 = vmax.f32 %v4367_v40, %v1405_v31 }
 0x299   : > { %5028 = vst [vmem:[#allocation82_spill] sm:$0xff] %v4375_v12  ;;  %1860 = vst.msk [vmem:[#allocation3 + $0x60] sm:$0xff] %vm1831_vm1, %v4375_v12  ;;  %1493 = vperm.xlu1 %2986, %v4375_v12  }
 0x29a   : > { %v1408_v46 = vpop.xlane.xlu1 %1407 }
 0x29b   : > { %v4385_v26 = vmax.f32 %v4377_v38, %v1408_v46 }
 0x29d   : > { %5030 = vst [vmem:[#allocation84_spill] sm:$0xff] %v4385_v26  ;;  %1861 = vst.msk [vmem:[#allocation3 + $0x68] sm:$0xff] %vm1831_vm1, %v4385_v26  ;;  %1498 = vperm.xlu0 %2985, %v4385_v26  }
 0x29e   : > { %v1411_v28 = vpop.xlane.xlu0 %1410 }
 0x29f   : > { %v4395_v40 = vmax.f32 %v4387_v25, %v1411_v28 }
 0x2a1   : > { %5032 = vst [vmem:[#allocation86_spill] sm:$0xff] %v4395_v40  ;;  %1862 = vst.msk [vmem:[#allocation3 + $0x70] sm:$0xff] %vm1831_vm1, %v4395_v40  ;;  %1503 = vperm.xlu1 %2986, %v4395_v40  }
 0x2a2   : > { %v1414_v31 = vpop.xlane.xlu1 %1413 }
 0x2a3   : > { %v4405_v38 = vmax.f32 %v4397_v27, %v1414_v31 }
 0x2a5   : > { %5034 = vst [vmem:[#allocation88_spill] sm:$0xff] %v4405_v38  ;;  %1863 = vst.msk [vmem:[#allocation3 + $0x78] sm:$0xff] %vm1831_vm1, %v4405_v38  ;;  %1508 = vperm.xlu0 %2985, %v4405_v38  }
 0x2e4   : > { %v1434_v28 = vpop.permute.xlu0 %1433 }
 0x2e5   : > { %v1511_v46 = vsub.f32 %v4012_v59, %v1434_v28  ;;  %v1512_v25 = vsub.f32 %v4014_v60, %v1434_v28 }
 0x2e7   : > { %v1543_v12 = vmin.f32 %v1511_v46, 0.0  ;;  %v1544_v52 = vmin.f32 %v1512_v25, 0.0 }
 0x2e8   : > { %v1439_v40 = vpop.permute.xlu1 %1438 }
 0x2e9   : > { %v1575_v13 = vmul.f32 1.442695, %v1543_v12  ;;  %v1577_v41 = vmul.f32 1.442695, %v1544_v52  ;;  %v1513_v31 = vsub.f32 %v4028_v8, %v1439_v40  ;;  %v1514_v7 = vsub.f32 %v4030_v9, %v1439_v40 }
 0x2eb   : > { %3035 = vpow2.f32 %v1575_v13  ;;  %v1545_v26 = vmin.f32 %v1513_v31, 0.0  ;;  %v1546_v27 = vmin.f32 %v1514_v7, 0.0 }
 0x2ec   : > { %3037 = vpow2.f32 %v1577_v41  ;;  %v1444_v56 = vpop.permute.xlu1 %1443 }
 0x2ed   : > { %v1579_v38 = vmul.f32 1.442695, %v1545_v26  ;;  %v1581_v37 = vmul.f32 1.442695, %v1546_v27  ;;  %v1515_v59 = vsub.f32 %v4044_v21, %v1444_v56  ;;  %v1516_v60 = vsub.f32 %v4046_v22, %v1444_v56 }
 0x2ef   : > { %3039 = vpow2.f32 %v1579_v38  ;;  %v1547_v25 = vmin.f32 %v1515_v59, 0.0  ;;  %v1548_v46 = vmin.f32 %v1516_v60, 0.0 }
 0x2f0   : > { %3041 = vpow2.f32 %v1581_v37  ;;  %v1449_v52 = vpop.permute.xlu1 %1448 }
 0x2f1   : > { %v1583_v12 = vmul.f32 1.442695, %v1547_v25  ;;  %v1585_v8 = vmul.f32 1.442695, %v1548_v46  ;;  %v1517_v9 = vsub.f32 %v4062_v42, %v1449_v52  ;;  %v1518_v40 = vsub.f32 %v4064_v47, %v1449_v52 }
 0x2f3   : > { %3043 = vpow2.f32 %v1583_v12  ;;  %v1549_v7 = vmin.f32 %v1517_v9, 0.0  ;;  %v1550_v41 = vmin.f32 %v1518_v40, 0.0  ;;  %v2648_v9 = vpop.f32.mrf.mxu0 }
 0x2f4   : > { %3045 = vpow2.f32 %v1585_v8  ;;  %v1454_v26 = vpop.permute.xlu1 %1453 }
 0x2f5   : > { %v1587_v13 = vmul.f32 1.442695, %v1549_v7  ;;  %v1589_v21 = vmul.f32 1.442695, %v1550_v41  ;;  %v1519_v22 = vsub.f32 %v4074_v63, %v1454_v26  ;;  %v1520_v56 = vsub.f32 %v4076_v0, %v1454_v26 }
 0x2f7   : > { %3047 = vpow2.f32 %v1587_v13  ;;  %v1551_v37 = vmin.f32 %v1519_v22, 0.0  ;;  %v1552_v38 = vmin.f32 %v1520_v56, 0.0  ;;  %v741_v22 = vld [vmem:[#allocation2 + $0x30] sm:$0xff] }
 0x2f8   : > { %v3036_v27 = vpop.eup %3035  ;;  %3049 = vpow2.f32 %v1589_v21  ;;  %v1459_v28 = vpop.permute.xlu1 %1458 }
 0x2f9   : > { %v3038_v42 = vpop.eup %3037  ;;  %v1591_v31 = vmul.f32 1.442695, %v1551_v37  ;;  %v1593_v47 = vmul.f32 1.442695, %v1552_v38  ;;  %v1521_v59 = vsub.f32 %v4090_v16, %v1459_v28  ;;  %v1522_v60 = vsub.f32 %v4092_v19, %v1459_v28  ;;  %v2649_v19 = vpop.f32.mrf.mxu0 }
 0x2fa   : > { %v1639_v25 = vmul.f32 %v3036_v27, %v3982_v33  ;;  %v1640_v46 = vmul.f32 %v3038_v42, %v3984_v34  ;;  %v2650_v56 = vadd.f32 %v2649_v19, %v2648_v9  ;;  %v743_v19 = vld [vmem:[#allocation2 + $0x58] sm:$0xff] }
 0x2fb   : > { %3051 = vpow2.f32 %v1591_v31  ;;  %v1553_v63 = vmin.f32 %v1521_v59, 0.0  ;;  %v1554_v0 = vmin.f32 %v1522_v60, 0.0  ;;  %v2651_v28 = vpop.f32.mrf.mxu0 }
 0x2fc   : > { %v3040_v52 = vpop.eup %3039  ;;  %3053 = vpow2.f32 %v1593_v47  ;;  %v1464_v12 = vpop.permute.xlu1 %1463  ;;  %v1767_v8 = vadd.f32 %v1640_v46, %v1639_v25  ;;  %v982_v59 = vadd.f32 %v2650_v56, %v741_v22 }
 0x2fd   : > { %v3042_v40 = vpop.eup %3041  ;;  %v1595_v7 = vmul.f32 1.442695, %v1553_v63  ;;  %v1597_v41 = vmul.f32 1.442695, %v1554_v0  ;;  %v1523_v26 = vsub.f32 %v4106_v49, %v1464_v12  ;;  %v1524_v16 = vsub.f32 %v4108_v50, %v1464_v12  ;;  %v2652_v60 = vpop.f32.mrf.mxu0  ;;  %v742_v63 = vld [vmem:[#allocation2] sm:$0xff] }
 0x2fe   : > { %1768 = vadd.xlane.f32.xlu1 %v1767_v8  ;;  %v1641_v33 = vmul.f32 %v3040_v52, %v3986_v35  ;;  %v1642_v34 = vmul.f32 %v3042_v40, %v3988_v36  ;;  %v2653_v0 = vadd.f32 %v2652_v60, %v2651_v28  ;;  %998 = vst [vmem:[#allocation2 + $0x30] sm:$0xff] %v982_v59 }
 0x2ff   : > { %3055 = vpow2.f32 %v1595_v7  ;;  %v1555_v13 = vmin.f32 %v1523_v26, 0.0  ;;  %v1556_v21 = vmin.f32 %v1524_v16, 0.0 }
 0x300   : > { %v3044_v37 = vpop.eup %3043  ;;  %3057 = vpow2.f32 %v1597_v41  ;;  %v1469_v38 = vpop.permute.xlu1 %1468  ;;  %v1770_v27 = vadd.f32 %v1642_v34, %v1641_v33  ;;  %v983_v26 = vadd.f32 %v2653_v0, %v742_v63  ;;  %v5035_v0 = vld [vmem:[#allocation42_spill] sm:$0xff] }
 0x301   : > { %v3046_v42 = vpop.eup %3045  ;;  %v1599_v49 = vmul.f32 1.442695, %v1555_v13  ;;  %v1601_v31 = vmul.f32 1.442695, %v1556_v21  ;;  %v1525_v50 = vsub.f32 %v4124_v14, %v1469_v38  ;;  %v1526_v35 = vsub.f32 %v4126_v15, %v1469_v38  ;;  %v2654_v14 = vpop.f32.mrf.mxu0 }
 0x302   : > { %1771 = vadd.xlane.f32.xlu0 %v1770_v27  ;;  %v1643_v36 = vmul.f32 %v3044_v37, %v3996_v43  ;;  %v1644_v47 = vmul.f32 %v3046_v42, %v3998_v44  ;;  %999 = vst [vmem:[#allocation2] sm:$0xff] %v983_v26  ;;  %v5036_v26 = vld [vmem:[#allocation60_spill] sm:$0xff] }
 0x303   : > { %3059 = vpow2.f32 %v1599_v49  ;;  %v1557_v25 = vmin.f32 %v1525_v50, 0.0  ;;  %v1558_v46 = vmin.f32 %v1526_v35, 0.0  ;;  %v2655_v16 = vpop.f32.mrf.mxu0  ;;  %v744_v50 = vld [vmem:[#allocation2 + $0x18] sm:$0xff] }
 0x304   : > { %v3048_v52 = vpop.eup %3047  ;;  %3061 = vpow2.f32 %v1601_v31  ;;  %v1474_v12 = vpop.permute.xlu1 %1473  ;;  %v1773_v8 = vadd.f32 %v1644_v47, %v1643_v36  ;;  %v2656_v13 = vadd.f32 %v2655_v16, %v2654_v14 }
 0x305   : > { %v3050_v9 = vpop.eup %3049  ;;  %v1603_v15 = vmul.f32 1.442695, %v1557_v25  ;;  %v1605_v40 = vmul.f32 1.442695, %v1558_v46  ;;  %v1527_v43 = vsub.f32 %v4136_v53, %v1474_v12  ;;  %v1528_v44 = vsub.f32 %v4138_v54, %v1474_v12 }
 0x306   : > { %1774 = vadd.xlane.f32.xlu0 %v1773_v8  ;;  %v1645_v7 = vmul.f32 %v3048_v52, %v4016_v61  ;;  %v1646_v41 = vmul.f32 %v3050_v9, %v4018_v62  ;;  %v2657_v62 = vpop.f32.mrf.mxu0  ;;  %v984_v42 = vadd.f32 %v2656_v13, %v743_v19  ;;  %v745_v9 = vld [vmem:[#allocation2 + $0x50] sm:$0xff]  ;;  %v5038_v19 = vld [vmem:[#allocation43_spill] sm:$0xff] }
 0x307   : > { %3063 = vpow2.f32 %v1603_v15  ;;  %v1559_v33 = vmin.f32 %v1527_v43, 0.0  ;;  %v1560_v34 = vmin.f32 %v1528_v44, 0.0 }
 0x308   : > { %v3052_v21 = vpop.eup %3051  ;;  %3065 = vpow2.f32 %v1605_v40  ;;  %v1479_v22 = vpop.permute.xlu0 %1478  ;;  %v1776_v56 = vadd.f32 %v1646_v41, %v1645_v7  ;;  %1000 = vst [vmem:[#allocation2 + $0x58] sm:$0xff] %v984_v42 }
 0x309   : > { %v3054_v53 = vpop.eup %3053  ;;  %v1607_v37 = vmul.f32 1.442695, %v1559_v33  ;;  %v1609_v54 = vmul.f32 1.442695, %v1560_v34  ;;  %v1529_v38 = vsub.f32 %v4152_v24, %v1479_v22  ;;  %v1530_v61 = vsub.f32 %v4154_v20, %v1479_v22  ;;  %v2658_v35 = vpop.f32.mrf.mxu0 }
 0x30a   : > { %1777 = vadd.xlane.f32.xlu1 %v1776_v56  ;;  %v1647_v27 = vmul.f32 %v3052_v21, %v4022_v1  ;;  %v1648_v28 = vmul.f32 %v3054_v53, %v4024_v2  ;;  %v2659_v24 = vadd.f32 %v2658_v35, %v2657_v62  ;;  %v5039_v21 = vld [vmem:[#allocation44_spill] sm:$0xff] }
 0x30b   : > { %3067 = vpow2.f32 %v1607_v37  ;;  %v1561_v49 = vmin.f32 %v1529_v38, 0.0  ;;  %v1562_v31 = vmin.f32 %v1530_v61, 0.0  ;;  %v2660_v2 = vpop.f32.mrf.mxu0 }
 0x30c   : > { %v3056_v36 = vpop.eup %3055  ;;  %3069 = vpow2.f32 %v1609_v54  ;;  %v1484_v47 = vpop.permute.xlu1 %1483  ;;  %v1779_v59 = vadd.f32 %v1648_v28, %v1647_v27  ;;  %v985_v12 = vadd.f32 %v2659_v24, %v744_v50  ;;  %v746_v54 = vld [vmem:[#allocation2 + $0x68] sm:$0xff]  ;;  %v5041_v24 = vld [vmem:[#allocation46_spill] sm:$0xff] }
 0x30d   : > { %v3058_v60 = vpop.eup %3057  ;;  %v1611_v20 = vmul.f32 1.442695, %v1561_v49  ;;  %v1613_v25 = vmul.f32 1.442695, %v1562_v31  ;;  %v1531_v46 = vsub.f32 %v4168_v48, %v1484_v47  ;;  %v1532_v1 = vsub.f32 %v4170_v5, %v1484_v47  ;;  %v2661_v15 = vpop.f32.mrf.mxu0  ;;  %v5040_v47 = vld [vmem:[#allocation45_spill] sm:$0xff] }
 0x30e   : > { %1780 = vadd.xlane.f32.xlu0 %v1779_v59  ;;  %v1649_v63 = vmul.f32 %v3056_v36, %v4038_v17  ;;  %v1650_v52 = vmul.f32 %v3058_v60, %v5035_v0  ;;  %1001 = vst [vmem:[#allocation2 + $0x18] sm:$0xff] %v985_v12  ;;  %v2662_v48 = vadd.f32 %v2661_v15, %v2660_v2  ;;  %v5037_v17 = vld [vmem:[#allocation61_spill] sm:$0xff] }
 0x30f   : > { %3071 = vpow2.f32 %v1611_v20  ;;  %v1563_v8 = vmin.f32 %v1531_v46, 0.0  ;;  %v1564_v14 = vmin.f32 %v1532_v1, 0.0  ;;  %v2663_v34 = vpop.f32.mrf.mxu0  ;;  %v747_v1 = vld [vmem:[#allocation2 + $0x8] sm:$0xff] }
 0x310   : > { %v3060_v40 = vpop.eup %3059  ;;  %3073 = vpow2.f32 %v1613_v25  ;;  %v1489_v43 = vpop.permute.xlu0 %1488  ;;  %v1782_v44 = vadd.f32 %v1650_v52, %v1649_v63  ;;  %v986_v56 = vadd.f32 %v2662_v48, %v745_v9 }
 0x311   : > { %v3062_v7 = vpop.eup %3061  ;;  %v1615_v5 = vmul.f32 1.442695, %v1563_v8  ;;  %v1617_v41 = vmul.f32 1.442695, %v1564_v14  ;;  %v1533_v16 = vsub.f32 %v5036_v26, %v1489_v43  ;;  %v1534_v33 = vsub.f32 %v5037_v17, %v1489_v43  ;;  %v2664_v38 = vpop.f32.mrf.mxu0  ;;  %v748_v26 = vld [vmem:[#allocation2 + $0x48] sm:$0xff] }
 0x312   : > { %1783 = vadd.xlane.f32.xlu1 %v1782_v44  ;;  %v1651_v13 = vmul.f32 %v3060_v40, %v5038_v19  ;;  %v1652_v22 = vmul.f32 %v3062_v7, %v5039_v21  ;;  %1002 = vst [vmem:[#allocation2 + $0x50] sm:$0xff] %v986_v56  ;;  %v2665_v28 = vadd.f32 %v2664_v38, %v2663_v34  ;;  %v5042_v40 = vld [vmem:[#allocation47_spill] sm:$0xff]  ;;  %v5043_v44 = vld [vmem:[#allocation48_spill] sm:$0xff] }
 0x313   : > { %3075 = vpow2.f32 %v1615_v5  ;;  %v1565_v53 = vmin.f32 %v1533_v16, 0.0  ;;  %v1566_v37 = vmin.f32 %v1534_v33, 0.0  ;;  %v2666_v36 = vpop.f32.mrf.mxu0 }
 0x314   : > { %v3064_v61 = vpop.eup %3063  ;;  %3077 = vpow2.f32 %v1617_v41  ;;  %v1494_v62 = vpop.permute.xlu1 %1493  ;;  %v1785_v27 = vadd.f32 %v1652_v22, %v1651_v13  ;;  %v987_v20 = vadd.f32 %v2665_v28, %v746_v54  ;;  %v5045_v54 = vld [vmem:[#allocation50_spill] sm:$0xff] }
 0x315   : > { %v3066_v42 = vpop.eup %3065  ;;  %v1619_v49 = vmul.f32 1.442695, %v1565_v53  ;;  %v1621_v31 = vmul.f32 1.442695, %v1566_v37  ;;  %v1535_v50 = vsub.f32 %v4190_v3, %v1494_v62  ;;  %v1536_v35 = vsub.f32 %v4192_v39, %v1494_v62  ;;  %v2667_v2 = vpop.f32.mrf.mxu0  ;;  %v5044_v53 = vld [vmem:[#allocation49_spill] sm:$0xff]  ;;  %v749_v28 = vld [vmem:[#allocation2 + $0x40] sm:$0xff] }
 0x316   : > { %1786 = vadd.xlane.f32.xlu0 %v1785_v27  ;;  %v1653_v59 = vmul.f32 %v3064_v61, %v5040_v47  ;;  %v1654_v60 = vmul.f32 %v3066_v42, %v5041_v24  ;;  %1003 = vst [vmem:[#allocation2 + $0x68] sm:$0xff] %v987_v20  ;;  %v2668_v3 = vadd.f32 %v2667_v2, %v2666_v36 }
 0x317   : > { %3079 = vpow2.f32 %v1619_v49  ;;  %v1567_v25 = vmin.f32 %v1535_v50, 0.0  ;;  %v1568_v46 = vmin.f32 %v1536_v35, 0.0  ;;  %v2669_v15 = vpop.f32.mrf.mxu0 }
 0x318   : > { %v3068_v63 = vpop.eup %3067  ;;  %3081 = vpow2.f32 %v1621_v31  ;;  %v1499_v0 = vpop.permute.xlu0 %1498  ;;  %v1788_v52 = vadd.f32 %v1654_v60, %v1653_v59  ;;  %v988_v7 = vadd.f32 %v2668_v3, %v747_v1  ;;  %v5046_v60 = vld [vmem:[#allocation51_spill] sm:$0xff] }
 0x319   : > { %v3070_v12 = vpop.eup %3069  ;;  %v1623_v39 = vmul.f32 1.442695, %v1567_v25  ;;  %v1625_v8 = vmul.f32 1.442695, %v1568_v46  ;;  %v1537_v14 = vsub.f32 %v4200_v11, %v1499_v0  ;;  %v1538_v9 = vsub.f32 %v4202_v18, %v1499_v0  ;;  %v2670_v16 = vpop.f32.mrf.mxu0  ;;  %v5047_v25 = vld [vmem:[#allocation52_spill] sm:$0xff]  ;;  %v750_v0 = vld [vmem:[#allocation2 + $0x20] sm:$0xff] }
 0x31a   : > { %1789 = vadd.xlane.f32.xlu1 %v1788_v52  ;;  %v1655_v43 = vmul.f32 %v3068_v63, %v5042_v40  ;;  %v1656_v48 = vmul.f32 %v3070_v12, %v5043_v44  ;;  %1004 = vst [vmem:[#allocation2 + $0x8] sm:$0xff] %v988_v7  ;;  %v2671_v11 = vadd.f32 %v2670_v16, %v2669_v15  ;;  %v5049_v40 = vld [vmem:[#allocation54_spill] sm:$0xff] }
 0x31b   : > { %3083 = vpow2.f32 %v1623_v39  ;;  %v1569_v5 = vmin.f32 %v1537_v14, 0.0  ;;  %v1570_v41 = vmin.f32 %v1538_v9, 0.0  ;;  %v2672_v56 = vpop.f32.mrf.mxu0  ;;  %v5048_v14 = vld [vmem:[#allocation53_spill] sm:$0xff] }
 0x31c   : > { %v3072_v17 = vpop.eup %3071  ;;  %3085 = vpow2.f32 %v1625_v8  ;;  %v1504_v33 = vpop.permute.xlu1 %1503  ;;  %v1791_v34 = vadd.f32 %v1656_v48, %v1655_v43  ;;  %v989_v61 = vadd.f32 %v2671_v11, %v748_v26  ;;  %v751_v48 = vld [vmem:[#allocation2 + $0x10] sm:$0xff] }
 0x31d   : > { %v3074_v19 = vpop.eup %3073  ;;  %v1627_v18 = vmul.f32 1.442695, %v1569_v5  ;;  %v1629_v13 = vmul.f32 1.442695, %v1570_v41  ;;  %v1539_v21 = vsub.f32 %v4208_v30, %v1504_v33  ;;  %v1540_v22 = vsub.f32 %v4210_v51, %v1504_v33  ;;  %v2673_v42 = vpop.f32.mrf.mxu0  ;;  %v5051_v11 = vld [vmem:[#allocation56_spill] sm:$0xff] }
 0x31e   : > { %1792 = vadd.xlane.f32.xlu0 %v1791_v34  ;;  %v1657_v37 = vmul.f32 %v3072_v17, %v5044_v53  ;;  %v1658_v38 = vmul.f32 %v3074_v19, %v5045_v54  ;;  %1005 = vst [vmem:[#allocation2 + $0x48] sm:$0xff] %v989_v61  ;;  %v2674_v30 = vadd.f32 %v2673_v42, %v2672_v56  ;;  %v5050_v17 = vld [vmem:[#allocation55_spill] sm:$0xff]  ;;  %v5052_v54 = vld [vmem:[#allocation57_spill] sm:$0xff]  ;;  %v753_v42 = vld [vmem:[#allocation2 + $0x60] sm:$0xff] }
 0x31f   : > { %3087 = vpow2.f32 %v1627_v18  ;;  %v1571_v62 = vmin.f32 %v1539_v21, 0.0  ;;  %v1572_v27 = vmin.f32 %v1540_v22, 0.0  ;;  %v2675_v24 = vpop.f32.mrf.mxu0 }
 0x320   : > { %v3076_v49 = vpop.eup %3075  ;;  %3089 = vpow2.f32 %v1629_v13  ;;  %v1509_v31 = vpop.permute.xlu0 %1508  ;;  %v1794_v50 = vadd.f32 %v1658_v38, %v1657_v37  ;;  %v990_v1 = vadd.f32 %v2674_v30, %v749_v28  ;;  %v752_v13 = vld [vmem:[#allocation2 + $0x38] sm:$0xff] }
 0x321   : > { %v3078_v35 = vpop.eup %3077  ;;  %v1631_v51 = vmul.f32 1.442695, %v1571_v62  ;;  %v1633_v36 = vmul.f32 1.442695, %v1572_v27  ;;  %v1541_v47 = vsub.f32 %v4214_v10, %v1509_v31  ;;  %v1542_v59 = vsub.f32 %v4216_v58, %v1509_v31  ;;  %v2676_v52 = vpop.f32.mrf.mxu0  ;;  %v5053_v62 = vld [vmem:[#allocation58_spill] sm:$0xff] }
 0x322   : > { %1795 = vadd.xlane.f32.xlu1 %v1794_v50  ;;  %v1659_v20 = vmul.f32 %v3076_v49, %v5046_v60  ;;  %v1660_v46 = vmul.f32 %v3078_v35, %v5047_v25  ;;  %1006 = vst [vmem:[#allocation2 + $0x40] sm:$0xff] %v990_v1  ;;  %v2677_v39 = vadd.f32 %v2676_v52, %v2675_v24  ;;  %v754_v60 = vld [vmem:[#allocation2 + $0x70] sm:$0xff] }
 0x323   : > { %3091 = vpow2.f32 %v1631_v51  ;;  %v1573_v2 = vmin.f32 %v1541_v47, 0.0  ;;  %v1574_v63 = vmin.f32 %v1542_v59, 0.0  ;;  %v2678_v15 = vpop.f32.mrf.mxu0  ;;  %v5054_v51 = vld [vmem:[#allocation59_spill] sm:$0xff] }
 0x324   : > { %v3080_v3 = vpop.eup %3079  ;;  %3093 = vpow2.f32 %v1633_v36  ;;  %v1797_v12 = vadd.f32 %v1660_v46, %v1659_v20  ;;  %v991_v44 = vadd.f32 %v2677_v39, %v750_v0 }
 0x325   : > { %v3082_v10 = vpop.eup %3081  ;;  %v1635_v8 = vmul.f32 1.442695, %v1573_v2  ;;  %v1637_v58 = vmul.f32 1.442695, %v1574_v63  ;;  %v1661_v9 = vmul.f32 %v3080_v3, %v5048_v14  ;;  %v2679_v7 = vpop.f32.mrf.mxu0  ;;  %v756_v14 = vld [vmem:[#allocation2 + $0x28] sm:$0xff] }
 0x326   : > { %1798 = vadd.xlane.f32.xlu0 %v1797_v12  ;;  %v1662_v43 = vmul.f32 %v3082_v10, %v5049_v40  ;;  %1007 = vst [vmem:[#allocation2 + $0x20] sm:$0xff] %v991_v44  ;;  %v2680_v26 = vadd.f32 %v2679_v7, %v2678_v15  ;;  %v755_v12 = vld [vmem:[#allocation2 + $0x78] sm:$0xff]  ;;  %v5056_v44 = vsub.f32 %v4253_v45, %v4262_v29  ;;  %v5065_v29 = vld [vmem:[#allocation67_spill] sm:$0xff] }
 0x327   : > { %3095 = vpow2.f32 %v1635_v8  ;;  %v2681_v34 = vpop.f32.mrf.mxu0 }
 0x328   : > { %v3084_v5 = vpop.eup %3083  ;;  %3097 = vpow2.f32 %v1637_v58  ;;  %v1800_v41 = vadd.f32 %v1662_v43, %v1661_v9  ;;  %v992_v18 = vadd.f32 %v2680_v26, %v751_v48  ;;  %v1688_v48 = vmin.f32 %v5056_v44, 0.0  ;;  %v5080_v44 = vld [vmem:[#allocation77_spill] sm:$0xff] }
 0x329   : > { %v3086_v16 = vpop.eup %3085  ;;  %v1663_v33 = vmul.f32 %v3084_v5, %v5050_v17  ;;  %v2682_v21 = vpop.f32.mrf.mxu0  ;;  %v5057_v5 = vld [vmem:[#allocation62_spill] sm:$0xff]  ;;  %v5059_v17 = vld [vmem:[#allocation63_spill] sm:$0xff] }
 0x32a   : > { %1801 = vadd.xlane.f32.xlu1 %v1800_v41  ;;  %v1664_v19 = vmul.f32 %v3086_v16, %v5051_v11  ;;  %1008 = vst [vmem:[#allocation2 + $0x10] sm:$0xff] %v992_v18  ;;  %v2683_v53 = vadd.f32 %v2682_v21, %v2681_v34  ;;  %v1705_v7 = vmul.f32 1.442695, %v1688_v48  ;;  %v5058_v41 = vsub.f32 %v4265_v4, %v5057_v5  ;;  %v5066_v21 = vld [vmem:[#allocation68_spill] sm:$0xff]  ;;  %v5081_v48 = vld [vmem:[#allocation78_spill] sm:$0xff] }
 0x32b   : > { %v2684_v61 = vpop.f32.mrf.mxu0 }
 0x32c   : > { %v3088_v22 = vpop.eup %3087  ;;  %v1803_v56 = vadd.f32 %v1664_v19, %v1663_v33  ;;  %v993_v28 = vadd.f32 %v2683_v53, %v752_v13  ;;  %v1689_v26 = vmin.f32 %v5058_v41, 0.0  ;;  %v5060_v33 = vld [vmem:[#allocation64_spill] sm:$0xff]  ;;  %v5063_v19 = vld [vmem:[#allocation66_spill] sm:$0xff] }
 0x32d   : > { %v3090_v37 = vpop.eup %3089  ;;  %v1665_v38 = vmul.f32 %v3088_v22, %v5052_v54  ;;  %v2685_v49 = vpop.f32.mrf.mxu0  ;;  %v5061_v34 = vsub.f32 %v5059_v17, %v5060_v33  ;;  %v5067_v22 = vsub.f32 %v5065_v29, %v5066_v21  ;;  %v1735_v53 = vld [vmem:[#allocation4] sm:$0xff]  ;;  %v5068_v54 = vld [vmem:[#allocation69_spill] sm:$0xff]  ;;  %v1740_v17 = vld [vmem:[#allocation4 + $0x28] sm:$0xff] }
 0x32e   : > { %1804 = vadd.xlane.f32.xlu0 %v1803_v56  ;;  %v1666_v27 = vmul.f32 %v3090_v37, %v5053_v62  ;;  %1009 = vst [vmem:[#allocation2 + $0x38] sm:$0xff] %v993_v28  ;;  %v2686_v30 = vadd.f32 %v2685_v49, %v2684_v61  ;;  %v1707_v16 = vmul.f32 1.442695, %v1689_v26  ;;  %v1736_v49 = vld [vmem:[#allocation4 + $0x8] sm:$0xff]  ;;  %v1741_v29 = vld [vmem:[#allocation4 + $0x30] sm:$0xff] }
 0x32f   : > { %v2687_v47 = vpop.f32.mrf.mxu0  ;;  %v1690_v11 = vmin.f32 %v5061_v34, 0.0  ;;  %v1692_v56 = vmin.f32 %v5067_v22, 0.0 }
 0x330   : > { %v3092_v31 = vpop.eup %3091  ;;  %v1806_v50 = vadd.f32 %v1666_v27, %v1665_v38  ;;  %v994_v24 = vadd.f32 %v2686_v30, %v753_v42  ;;  %v5069_v38 = vld [vmem:[#allocation70_spill] sm:$0xff]  ;;  %v5071_v30 = vld [vmem:[#allocation71_spill] sm:$0xff] }
 0x331   : > { %v3094_v35 = vpop.eup %3093  ;;  %v1667_v36 = vmul.f32 %v3092_v31, %v5054_v51  ;;  %v2688_v20 = vpop.f32.mrf.mxu0  ;;  %v1713_v37 = vmul.f32 1.442695, %v1692_v56  ;;  %v5070_v61 = vsub.f32 %v5068_v54, %v5069_v38  ;;  %v5086_v56 = vld [vmem:[#allocation81_spill] sm:$0xff] }
 0x332   : > { %1807 = vadd.xlane.f32.xlu1 %v1806_v50  ;;  %v1668_v59 = vmul.f32 %v3094_v35, %v4178_v6  ;;  %1010 = vst [vmem:[#allocation2 + $0x60] sm:$0xff] %v994_v24  ;;  %v2689_v1 = vadd.f32 %v2688_v20, %v2687_v47  ;;  %v5072_v35 = vld [vmem:[#allocation72_spill] sm:$0xff] }
 0x333   : > { %v2690_v0 = vpop.f32.mrf.mxu0  ;;  %v1693_v62 = vmin.f32 %v5070_v61, 0.0  ;;  %v5073_v51 = vsub.f32 %v5071_v30, %v5072_v35 }
 0x334   : > { %v3096_v25 = vpop.eup %3095  ;;  %v1809_v46 = vadd.f32 %v1668_v59, %v1667_v36  ;;  %v995_v3 = vadd.f32 %v2689_v1, %v754_v60  ;;  %v1737_v60 = vld [vmem:[#allocation4 + $0x10] sm:$0xff]  ;;  %v5075_v1 = vld [vmem:[#allocation74_spill] sm:$0xff] }
 0x335   : > { %v3098_v2 = vpop.eup %3097  ;;  %v1669_v63 = vmul.f32 %v3096_v25, %v4194_v32  ;;  %v2691_v39 = vpop.f32.mrf.mxu0  ;;  %v5055_v32 = vsub.f32 %v4248_v55, %v4251_v23  ;;  %v1709_v55 = vmul.f32 1.442695, %v1690_v11  ;;  %v5062_v23 = vld [vmem:[#allocation65_spill] sm:$0xff]  ;;  %v1715_v50 = vmul.f32 1.442695, %v1693_v62  ;;  %v5083_v11 = vld [vmem:[#allocation79_spill] sm:$0xff] }
 0x336   : > { %1810 = vadd.xlane.f32.xlu0 %v1809_v46  ;;  %v1670_v52 = vmul.f32 %v3098_v2, %v4196_v57  ;;  %1011 = vst [vmem:[#allocation2 + $0x70] sm:$0xff] %v995_v3  ;;  %v2692_v6 = vadd.f32 %v2691_v39, %v2690_v0  ;;  %v5064_v18 = vsub.f32 %v5062_v23, %v5063_v19  ;;  %v1694_v36 = vmin.f32 %v5073_v51, 0.0  ;;  %v5074_v46 = vld [vmem:[#allocation73_spill] sm:$0xff] }
 0x337   : > { %v2693_v8 = vpop.f32.mrf.mxu0  ;;  %v1687_v43 = vmin.f32 %v5055_v32, 0.0  ;;  %v5076_v2 = vsub.f32 %v5074_v46, %v5075_v1  ;;  %v1739_v32 = vld [vmem:[#allocation4 + $0x20] sm:$0xff]  ;;  %v1742_v62 = vld [vmem:[#allocation4 + $0x38] sm:$0xff] }
 0x338   : > { %v1812_v10 = vadd.f32 %v1670_v52, %v1669_v63  ;;  %v996_v58 = vadd.f32 %v2692_v6, %v755_v12  ;;  %v1691_v13 = vmin.f32 %v5064_v18, 0.0  ;;  %v1717_v25 = vmul.f32 1.442695, %v1694_v36  ;;  %v1738_v12 = vld [vmem:[#allocation4 + $0x18] sm:$0xff]  ;;  %v5077_v6 = vld [vmem:[#allocation75_spill] sm:$0xff]  ;;  %v1743_v36 = vld [vmem:[#allocation4 + $0x40] sm:$0xff] }
 0x339   : > { %v2694_v9 = vpop.f32.mrf.mxu0  ;;  %v1703_v57 = vmul.f32 1.442695, %v1687_v43  ;;  %v1695_v63 = vmin.f32 %v5076_v2, 0.0 }
 0x33a   : > { %1813 = vadd.xlane.f32.xlu1 %v1812_v10  ;;  %1012 = vst [vmem:[#allocation2 + $0x78] sm:$0xff] %v996_v58  ;;  %v2695_v15 = vadd.f32 %v2694_v9, %v2693_v8  ;;  %v1711_v45 = vmul.f32 1.442695, %v1691_v13  ;;  %v5078_v8 = vld [vmem:[#allocation76_spill] sm:$0xff] }
 0x33b   : > { %3099 = vpow2.f32 %v1703_v57  ;;  %v1719_v10 = vmul.f32 1.442695, %v1695_v63  ;;  %v5079_v58 = vsub.f32 %v5077_v6, %v5078_v8  ;;  %v1744_v63 = vld [vmem:[#allocation4 + $0x48] sm:$0xff] }
 0x33c   : > { %v997_v40 = vadd.f32 %v2695_v15, %v756_v14  ;;  %3101 = vpow2.f32 %v1705_v7  ;;  %v5082_v7 = vsub.f32 %v5080_v44, %v5081_v48 }
 0x33d   : > { %3103 = vpow2.f32 %v1707_v16  ;;  %v1696_v14 = vmin.f32 %v5079_v58, 0.0 }
 0x33e   : > { %1013 = vst [vmem:[#allocation2 + $0x28] sm:$0xff] %v997_v40  ;;  %3105 = vpow2.f32 %v1709_v55  ;;  %v1697_v5 = vmin.f32 %v5082_v7, 0.0  ;;  %v5084_v55 = vld [vmem:[#allocation80_spill] sm:$0xff] }
 0x33f   : > { %3107 = vpow2.f32 %v1711_v45  ;;  %v1721_v57 = vmul.f32 1.442695, %v1696_v14  ;;  %v5085_v23 = vsub.f32 %v5083_v11, %v5084_v55  ;;  %v1745_v14 = vld [vmem:[#allocation4 + $0x50] sm:$0xff] }
 0x340   : > { %3109 = vpow2.f32 %v1713_v37  ;;  %v1723_v34 = vmul.f32 1.442695, %v1697_v5 }
 0x341   : > { %3111 = vpow2.f32 %v1715_v50  ;;  %v1698_v19 = vmin.f32 %v5085_v23, 0.0 }
 0x342   : > { %3113 = vpow2.f32 %v1717_v25 }
 0x343   : > { %3115 = vpow2.f32 %v1719_v10  ;;  %v1725_v22 = vmul.f32 1.442695, %v1698_v19 }
 0x344   : > { %3117 = vpow2.f32 %v1721_v57  ;;  %v1746_v57 = vld [vmem:[#allocation4 + $0x58] sm:$0xff] }
 0x345   : > { %3119 = vpow2.f32 %v1723_v34  ;;  %v1748_v34 = vld [vmem:[#allocation4 + $0x68] sm:$0xff] }
 0x346   : > { %3121 = vpow2.f32 %v1725_v22  ;;  %v1750_v22 = vld [vmem:[#allocation4 + $0x78] sm:$0xff] }
 0x348   : > { %v3100_v4 = vpop.eup %3099 }
 0x349   : > { %v1751_v27 = vmul.f32 %v3100_v4, %v1735_v53  ;;  %v3102_v28 = vpop.eup %3101  ;;  %v5087_v4 = vld [vmem:[#allocation82_spill] sm:$0xff] }
 0x34a   : > { %v1752_v47 = vmul.f32 %v3102_v28, %v1736_v49  ;;  %v3104_v59 = vpop.eup %3103  ;;  %v5088_v53 = vsub.f32 %v5086_v56, %v5087_v4  ;;  %v5090_v49 = vld [vmem:[#allocation84_spill] sm:$0xff] }
 0x34b   : > { %v1753_v0 = vmul.f32 %v3104_v59, %v1737_v60  ;;  %v3106_v52 = vpop.eup %3105  ;;  %v5093_v60 = vld [vmem:[#allocation86_spill] sm:$0xff] }
 0x34c   : > { %v1754_v9 = vmul.f32 %v3106_v52, %v1738_v12  ;;  %v3108_v15 = vpop.eup %3107  ;;  %v1699_v37 = vmin.f32 %v5088_v53, 0.0  ;;  %v5096_v12 = vld [vmem:[#allocation88_spill] sm:$0xff] }
 0x34d   : > { %v1755_v41 = vmul.f32 %v3108_v15, %v1739_v32  ;;  %v3110_v26 = vpop.eup %3109 }
 0x34e   : > { %v1756_v18 = vmul.f32 %v3110_v26, %v1740_v17  ;;  %v3112_v13 = vpop.eup %3111  ;;  %v1727_v28 = vmul.f32 1.442695, %v1699_v37 }
 0x34f   : > { %v1757_v54 = vmul.f32 %v3112_v13, %v1741_v29  ;;  %v3114_v38 = vpop.eup %3113 }
 0x350   : > { %v1758_v30 = vmul.f32 %v3114_v38, %v1742_v62  ;;  %v3116_v35 = vpop.eup %3115  ;;  %3123 = vpow2.f32 %v1727_v28 }
 0x351   : > { %v1759_v46 = vmul.f32 %v3116_v35, %v1743_v36  ;;  %v3118_v1 = vpop.eup %3117 }
 0x352   : > { %v1760_v6 = vmul.f32 %v3118_v1, %v1744_v63  ;;  %v3120_v8 = vpop.eup %3119 }
 0x353   : > { %v3122_v32 = vpop.eup %3121 }
 0x354   : > { %v1762_v48 = vmul.f32 %v3122_v32, %v1746_v57 }
 0x35d   : > { %v3124_v7 = vpop.eup %3123 }
 0x387   : > { %v1769_v42 = vpop.xlane.xlu1 %1768 }
 0x388   : > { %v1815_v31 = vadd.f32 %v1769_v42, %v1751_v27  ;;  %v5089_v42 = vld [vmem:[#allocation83_spill] sm:$0xff] }
 0x38a   : > { %1832 = vst.msk [vmem:[#allocation4] sm:$0xff] %vm1831_vm1, %v1815_v31  ;;  %v5091_v31 = vsub.f32 %v5089_v42, %v5090_v49 }
 0x38b   : > { %v1772_v24 = vpop.xlane.xlu0 %1771 }
 0x38c   : > { %v1816_v20 = vadd.f32 %v1772_v24, %v1752_v47  ;;  %v1700_v50 = vmin.f32 %v5091_v31, 0.0  ;;  %v5092_v24 = vld [vmem:[#allocation85_spill] sm:$0xff] }
 0x38e   : > { %1833 = vst.msk [vmem:[#allocation4 + $0x8] sm:$0xff] %vm1831_vm1, %v1816_v20  ;;  %v1729_v59 = vmul.f32 1.442695, %v1700_v50  ;;  %v5094_v20 = vsub.f32 %v5092_v24, %v5093_v60 }
 0x38f   : > { %v1775_v3 = vpop.xlane.xlu0 %1774 }
 0x390   : > { %v1817_v39 = vadd.f32 %v1775_v3, %v1753_v0  ;;  %v1701_v25 = vmin.f32 %v5094_v20, 0.0  ;;  %3125 = vpow2.f32 %v1729_v59  ;;  %v5095_v3 = vld [vmem:[#allocation87_spill] sm:$0xff] }
 0x392   : > { %1834 = vst.msk [vmem:[#allocation4 + $0x10] sm:$0xff] %vm1831_vm1, %v1817_v39  ;;  %v1731_v52 = vmul.f32 1.442695, %v1701_v25  ;;  %v5097_v39 = vsub.f32 %v5095_v3, %v5096_v12 }
 0x393   : > { %v1778_v40 = vpop.xlane.xlu1 %1777 }
 0x394   : > { %v1818_v43 = vadd.f32 %v1778_v40, %v1754_v9  ;;  %v1702_v10 = vmin.f32 %v5097_v39, 0.0  ;;  %3127 = vpow2.f32 %v1731_v52  ;;  %v1761_v40 = vmul.f32 %v3120_v8, %v1745_v14 }
 0x396   : > { %1835 = vst.msk [vmem:[#allocation4 + $0x18] sm:$0xff] %vm1831_vm1, %v1818_v43  ;;  %v1733_v15 = vmul.f32 1.442695, %v1702_v10 }
 0x397   : > { %v1781_v16 = vpop.xlane.xlu0 %1780 }
 0x398   : > { %v1819_v33 = vadd.f32 %v1781_v16, %v1755_v41  ;;  %3129 = vpow2.f32 %v1733_v15  ;;  %v1747_v41 = vld [vmem:[#allocation4 + $0x60] sm:$0xff] }
 0x399   : > { %v1763_v16 = vmul.f32 %v3124_v7, %v1747_v41 }
 0x39a   : > { %1836 = vst.msk [vmem:[#allocation4 + $0x20] sm:$0xff] %vm1831_vm1, %v1819_v33 }
 0x39b   : > { %v1784_v45 = vpop.xlane.xlu1 %1783 }
 0x39c   : > { %v1820_v21 = vadd.f32 %v1784_v45, %v1756_v18  ;;  %v1749_v18 = vld [vmem:[#allocation4 + $0x70] sm:$0xff] }
 0x39d   : > { %v3126_v17 = vpop.eup %3125 }
 0x39e   : > { %1837 = vst.msk [vmem:[#allocation4 + $0x28] sm:$0xff] %vm1831_vm1, %v1820_v21  ;;  %v1764_v55 = vmul.f32 %v3126_v17, %v1748_v34 }
 0x39f   : > { %v1787_v61 = vpop.xlane.xlu0 %1786 }
 0x3a0   : > { %v1821_v27 = vadd.f32 %v1787_v61, %v1757_v54 }
 0x3a1   : > { %v3128_v23 = vpop.eup %3127 }
 0x3a2   : > { %1838 = vst.msk [vmem:[#allocation4 + $0x30] sm:$0xff] %vm1831_vm1, %v1821_v27  ;;  %v1765_v45 = vmul.f32 %v3128_v23, %v1749_v18 }
 0x3a3   : > { %v1790_v51 = vpop.xlane.xlu1 %1789 }
 0x3a4   : > { %v1822_v47 = vadd.f32 %v1790_v51, %v1758_v30 }
 0x3a5   : > { %v3130_v29 = vpop.eup %3129 }
 0x3a6   : > { %1839 = vst.msk [vmem:[#allocation4 + $0x38] sm:$0xff] %vm1831_vm1, %v1822_v47  ;;  %v1766_v4 = vmul.f32 %v3130_v29, %v1750_v22 }
 0x3a7   : > { %v1793_v2 = vpop.xlane.xlu0 %1792 }
 0x3a8   : > { %v1823_v0 = vadd.f32 %v1793_v2, %v1759_v46 }
 0x3aa   : > { %1840 = vst.msk [vmem:[#allocation4 + $0x40] sm:$0xff] %vm1831_vm1, %v1823_v0 }
 0x3ab   : > { %v1796_v58 = vpop.xlane.xlu1 %1795 }
 0x3ac   : > { %v1824_v9 = vadd.f32 %v1796_v58, %v1760_v6 }
 0x3ae   : > { %1841 = vst.msk [vmem:[#allocation4 + $0x48] sm:$0xff] %vm1831_vm1, %v1824_v9 }
 0x3af   : > { %v1799_v43 = vpop.xlane.xlu0 %1798 }
 0x3b0   : > { %v1825_v44 = vadd.f32 %v1799_v43, %v1761_v40 }
 0x3b2   : > { %1842 = vst.msk [vmem:[#allocation4 + $0x50] sm:$0xff] %vm1831_vm1, %v1825_v44 }
 0x3b3   : > { %v1802_v5 = vpop.xlane.xlu1 %1801 }
 0x3b4   : > { %v1826_v26 = vadd.f32 %v1802_v5, %v1762_v48 }
 0x3b6   : > { %1843 = vst.msk [vmem:[#allocation4 + $0x58] sm:$0xff] %vm1831_vm1, %v1826_v26 }
 0x3b7   : > { %v1805_v33 = vpop.xlane.xlu0 %1804 }
 0x3b8   : > { %v1827_v11 = vadd.f32 %v1805_v33, %v1763_v16 }
 0x3ba   : > { %1844 = vst.msk [vmem:[#allocation4 + $0x60] sm:$0xff] %vm1831_vm1, %v1827_v11 }
 0x3bb   : > { %v1808_v19 = vpop.xlane.xlu1 %1807 }
 0x3bc   : > { %v1828_v13 = vadd.f32 %v1808_v19, %v1764_v55 }
 0x3be   : > { %1845 = vst.msk [vmem:[#allocation4 + $0x68] sm:$0xff] %vm1831_vm1, %v1828_v13 }
 0x3bf   : > { %v1811_v21 = vpop.xlane.xlu0 %1810 }
 0x3c0   : > { %v1829_v56 = vadd.f32 %v1811_v21, %v1765_v45 }
 0x3c2   : > { %1846 = vst.msk [vmem:[#allocation4 + $0x70] sm:$0xff] %vm1831_vm1, %v1829_v56  ;;  %1867 = sbr.rel (%p2619_p10) target bundleno = 1211 (0x4bb), region = 84 }
 0x3c3   : > { %v1814_v53 = vpop.xlane.xlu1 %1813 }
 0x3c4   : > { %v1830_v37 = vadd.f32 %v1814_v53, %v1766_v4 }
 0x3c6   : > { %1847 = vst.msk [vmem:[#allocation4 + $0x78] sm:$0xff] %vm1831_vm1, %v1830_v37 }
 0x3c7   : > { %v1950_v54 = vld [vmem:[#allocation15 + $0x78] sm:$0xff]  ;;  %v1949_v38 = vld [vmem:[#allocation15 + $0x70] sm:$0xff]  ;;  %v1948_v61 = vld [vmem:[#allocation15 + $0x68] sm:$0xff]  ;;  %v4545_v47 = vstv %s1869_s7 }
 0x3c8   : > { %2728 = vmatprep.subr.mxu0 %v1950_v54  ;;  %2784 = vmatprep.subr.mxu1 %v1950_v54  ;;  %v1947_v62 = vld [vmem:[#allocation15 + $0x60] sm:$0xff]  ;;  %v1946_v27 = vld [vmem:[#allocation15 + $0x58] sm:$0xff]  ;;  %v1945_v28 = vld [vmem:[#allocation15 + $0x50] sm:$0xff] }
 0x3c9   : > { %2729 = vmatpush3.msra.mxu0 %v1950_v54  ;;  %2800 = vmatpush3.msra.mxu1 %v1950_v54  ;;  %v1944_v42 = vld [vmem:[#allocation15 + $0x48] sm:$0xff]  ;;  %v1943_v49 = vld [vmem:[#allocation15 + $0x40] sm:$0xff]  ;;  %v1942_v31 = vld [vmem:[#allocation15 + $0x38] sm:$0xff] }
 0x3ca   : > { %2730 = vmatprep.subr.mxu0 %v1949_v38  ;;  %2785 = vmatprep.subr.mxu1 %v1949_v38  ;;  %v1941_v50 = vld [vmem:[#allocation15 + $0x30] sm:$0xff]  ;;  %v1940_v30 = vld [vmem:[#allocation15 + $0x28] sm:$0xff]  ;;  %v1939_v35 = vld [vmem:[#allocation15 + $0x20] sm:$0xff] }
 0x3cb   : > { %2731 = vmatpush3.msra.mxu0 %v1949_v38  ;;  %2801 = vmatpush3.msra.mxu1 %v1949_v38  ;;  %v1938_v51 = vld [vmem:[#allocation15 + $0x18] sm:$0xff]  ;;  %v1870_v36 = vld [vmem:[%s3889_s6] sm:$0xff]  ;;  %v1871_v24 = vld [vmem:[%s3889_s6 + $0x8] sm:$0xff] }
 0x3cc   : > { %2732 = vmatprep.subr.mxu0 %v1948_v61  ;;  %2786 = vmatprep.subr.mxu1 %v1948_v61  ;;  %v1878_v59 = vld [vmem:[%s3889_s6 + $0x40] sm:$0xff]  ;;  %v1879_v60 = vld [vmem:[%s3889_s6 + $0x48] sm:$0xff]  ;;  %v1937_v20 = vld [vmem:[#allocation15 + $0x10] sm:$0xff]  ;;  %v1887_v25 = vmul.f32 %v4545_v47, %v1870_v36  ;;  %v1888_v52 = vmul.f32 %v4545_v47, %v1871_v24 }
 0x3cd   : > { %2733 = vmatpush3.msra.mxu0 %v1948_v61  ;;  %2802 = vmatpush3.msra.mxu1 %v1948_v61  ;;  %v1872_v46 = vld [vmem:[%s3889_s6 + $0x10] sm:$0xff]  ;;  %v1936_v2 = vld [vmem:[#allocation15 + $0x8] sm:$0xff]  ;;  %v1895_v0 = vmul.f32 %v4545_v47, %v1878_v59  ;;  %v1896_v3 = vmul.f32 %v4545_v47, %v1879_v60  ;;  %v1935_v12 = vld [vmem:[#allocation15] sm:$0xff] }
 0x3ce   : > { %2734 = vmatprep.subr.mxu0 %v1947_v62  ;;  %2787 = vmatprep.subr.mxu1 %v1947_v62  ;;  %v1880_v1 = vld [vmem:[%s3889_s6 + $0x50] sm:$0xff]  ;;  %v1911_v39 = vld [vmem:[#allocation2 + $0x40] sm:$0xff]  ;;  %v1889_v8 = vmul.f32 %v4545_v47, %v1872_v46  ;;  %v1873_v14 = vld [vmem:[%s3889_s6 + $0x18] sm:$0xff] }
 0x3cf   : > { %2735 = vmatpush3.msra.mxu0 %v1947_v62  ;;  %2803 = vmatpush3.msra.mxu1 %v1947_v62  ;;  %v1903_v63 = vld [vmem:[#allocation2 + $0x30] sm:$0xff]  ;;  %v1904_v10 = vld [vmem:[#allocation2] sm:$0xff]  ;;  %v1897_v58 = vmul.f32 %v4545_v47, %v1880_v1  ;;  %v1881_v9 = vld [vmem:[%s3889_s6 + $0x58] sm:$0xff]  ;;  %v1927_v44 = vadd.f32 %v1911_v39, %v1895_v0  ;;  %v1890_v5 = vmul.f32 %v4545_v47, %v1873_v14 }
 0x3d0   : > { %2736 = vmatprep.subr.mxu0 %v1946_v27  ;;  %2788 = vmatprep.subr.mxu1 %v1946_v27  ;;  %v1912_v6 = vld [vmem:[#allocation2 + $0x20] sm:$0xff]  ;;  %v1919_v40 = vadd.f32 %v1903_v63, %v1887_v25  ;;  %v1905_v32 = vld [vmem:[#allocation2 + $0x58] sm:$0xff]  ;;  %v1913_v43 = vld [vmem:[#allocation2 + $0x10] sm:$0xff]  ;;  %v1920_v48 = vadd.f32 %v1904_v10, %v1888_v52  ;;  %v1898_v41 = vmul.f32 %v4545_v47, %v1881_v9 }
 0x3d1   : > { %2737 = vmatpush3.msra.mxu0 %v1946_v27  ;;  %2804 = vmatpush3.msra.mxu1 %v1946_v27  ;;  %v1874_v15 = vld [vmem:[%s3889_s6 + $0x20] sm:$0xff]  ;;  %v1928_v7 = vadd.f32 %v1912_v6, %v1896_v3  ;;  %v1875_v16 = vld [vmem:[%s3889_s6 + $0x28] sm:$0xff]  ;;  %v1921_v33 = vadd.f32 %v1905_v32, %v1889_v8  ;;  %v1929_v34 = vadd.f32 %v1913_v43, %v1897_v58  ;;  %v1906_v11 = vld [vmem:[#allocation2 + $0x18] sm:$0xff] }
 0x3d2   : > { %2738 = vmatprep.subr.mxu0 %v1945_v28  ;;  %2789 = vmatprep.subr.mxu1 %v1945_v28  ;;  %v1882_v57 = vld [vmem:[%s3889_s6 + $0x60] sm:$0xff]  ;;  %v1891_v26 = vmul.f32 %v4545_v47, %v1874_v15  ;;  %v1883_v17 = vld [vmem:[%s3889_s6 + $0x68] sm:$0xff]  ;;  %v1914_v55 = vld [vmem:[#allocation2 + $0x38] sm:$0xff]  ;;  %v1892_v29 = vmul.f32 %v4545_v47, %v1875_v16  ;;  %v1922_v22 = vadd.f32 %v1906_v11, %v1890_v5 }
 0x3d3   : > { %2739 = vmatpush3.msra.mxu0 %v1945_v28  ;;  %2805 = vmatpush3.msra.mxu1 %v1945_v28  ;;  %v1907_v23 = vld [vmem:[#allocation2 + $0x50] sm:$0xff]  ;;  %v1899_v19 = vmul.f32 %v4545_v47, %v1882_v57  ;;  %v1915_v18 = vld [vmem:[#allocation2 + $0x60] sm:$0xff]  ;;  %v1900_v21 = vmul.f32 %v4545_v47, %v1883_v17  ;;  %v1930_v56 = vadd.f32 %v1914_v55, %v1898_v41  ;;  %v1908_v53 = vld [vmem:[#allocation2 + $0x68] sm:$0xff] }
 0x3d4   : > { %2740 = vmatprep.subr.mxu0 %v1944_v42  ;;  %2790 = vmatprep.subr.mxu1 %v1944_v42  ;;  %v1876_v13 = vld [vmem:[%s3889_s6 + $0x30] sm:$0xff]  ;;  %v1923_v4 = vadd.f32 %v1907_v23, %v1891_v26  ;;  %v1877_v62 = vld [vmem:[%s3889_s6 + $0x38] sm:$0xff]  ;;  %v1909_v28 = vld [vmem:[#allocation2 + $0x8] sm:$0xff] }
 0x3d5   : > { %2741 = vmatpush3.msra.mxu0 %v1944_v42  ;;  %2806 = vmatpush3.msra.mxu1 %v1944_v42  ;;  %v1884_v45 = vld [vmem:[%s3889_s6 + $0x70] sm:$0xff]  ;;  %v1931_v37 = vadd.f32 %v1915_v18, %v1899_v19  ;;  %v1893_v38 = vmul.f32 %v4545_v47, %v1876_v13  ;;  %v1885_v27 = vld [vmem:[%s3889_s6 + $0x78] sm:$0xff]  ;;  %v1910_v36 = vld [vmem:[#allocation2 + $0x48] sm:$0xff] }
 0x3d6   : > { %2742 = vmatprep.subr.mxu0 %v1943_v49  ;;  %2791 = vmatprep.subr.mxu1 %v1943_v49  ;;  %v1916_v54 = vld [vmem:[#allocation2 + $0x70] sm:$0xff]  ;;  %v1901_v61 = vmul.f32 %v4545_v47, %v1884_v45  ;;  %v1917_v42 = vld [vmem:[#allocation2 + $0x78] sm:$0xff]  ;;  %v1918_v59 = vld [vmem:[#allocation2 + $0x28] sm:$0xff] }
 0x3d7   : > { %2743 = vmatpush3.msra.mxu0 %v1943_v49  ;;  %2807 = vmatpush3.msra.mxu1 %v1943_v49  ;;  %v1924_v49 = vadd.f32 %v1908_v53, %v1892_v29  ;;  %v4580_v25 = vld [vmem:[#allocation4 + $0x8] sm:$0xff]  ;;  %v4582_v46 = vld [vmem:[#allocation4 + $0x10] sm:$0xff]  ;;  %v4587_v1 = vld [vmem:[#allocation4 + $0x20] sm:$0xff] }
 0x3d8   : > { %2744 = vmatprep.subr.mxu0 %v1942_v31  ;;  %2792 = vmatprep.subr.mxu1 %v1942_v31  ;;  %v4593_v63 = vld [vmem:[#allocation4 + $0x30] sm:$0xff]  ;;  %v4596_v0 = vld [vmem:[#allocation4 + $0x38] sm:$0xff]  ;;  %v4599_v52 = vld [vmem:[#allocation4 + $0x40] sm:$0xff]  ;;  %vm2168_vm3 = vcmp.gt.f32.partialorder %v4580_v25, 0.0  ;;  %vm2169_vm4 = vcmp.gt.f32.partialorder %v4582_v46, 0.0  ;;  %vm2171_vm6 = vcmp.gt.f32.partialorder %v4587_v1, 0.0 }
 0x3d9   : > { %2745 = vmatpush3.msra.mxu0 %v1942_v31  ;;  %2808 = vmatpush3.msra.mxu1 %v1942_v31  ;;  %v1932_v31 = vadd.f32 %v1916_v54, %v1900_v21  ;;  %v4602_v3 = vld [vmem:[#allocation4 + $0x48] sm:$0xff]  ;;  %v4608_v39 = vld [vmem:[#allocation4 + $0x58] sm:$0xff]  ;;  %v4611_v10 = vld [vmem:[#allocation4 + $0x60] sm:$0xff]  ;;  %vm2173_vm8 = vcmp.gt.f32.partialorder %v4593_v63, 0.0  ;;  %vm2174_vm9 = vcmp.gt.f32.partialorder %v4596_v0, 0.0  ;;  %vm2175_vm10 = vcmp.gt.f32.partialorder %v4599_v52, 0.0 }
 0x3da   : > { %2746 = vmatprep.subr.mxu0 %v1941_v50  ;;  %2793 = vmatprep.subr.mxu1 %v1941_v50  ;;  %v4615_v6 = vld [vmem:[#allocation4 + $0x68] sm:$0xff]  ;;  %v4618_v8 = vld [vmem:[#allocation4 + $0x70] sm:$0xff]  ;;  %v4621_v14 = vld [vmem:[#allocation4 + $0x78] sm:$0xff]  ;;  %vm2176_vm11 = vcmp.gt.f32.partialorder %v4602_v3, 0.0  ;;  %vm2178_vm13 = vcmp.gt.f32.partialorder %v4608_v39, 0.0  ;;  %vm2179_vm14 = vcmp.gt.f32.partialorder %v4611_v10, 0.0 }
 0x3db   : > { %2747 = vmatpush3.msra.mxu0 %v1941_v50  ;;  %2809 = vmatpush3.msra.mxu1 %v1941_v50  ;;  %v1894_v50 = vmul.f32 %v4545_v47, %v1877_v62  ;;  %v2119_v15 = vld [vmem:[#allocation3] sm:$0xff]  ;;  %v2121_v32 = vld [vmem:[#allocation3 + $0x10] sm:$0xff]  ;;  %v2122_v57 = vld [vmem:[#allocation3 + $0x18] sm:$0xff]  ;;  %vm2180_vm15 = vcmp.gt.f32.partialorder %v4615_v6, 0.0  ;;  %vm2181_vm0 = vcmp.gt.f32.partialorder %v4618_v8, 0.0 }
 0x3dc   : > { %2748 = vmatprep.subr.mxu0 %v1940_v30  ;;  %2794 = vmatprep.subr.mxu1 %v1940_v30  ;;  %2135 = vst.msk [vmem:[%s3906_s10] sm:$0xff] %vm1831_vm1, %v2119_v15  ;;  %2137 = vst.msk [vmem:[%s3906_s10 + $0x10] sm:$0xff] %vm1831_vm1, %v2121_v32  ;;  %v2125_v5 = vld [vmem:[#allocation3 + $0x30] sm:$0xff]  ;;  %v2126_v41 = vld [vmem:[#allocation3 + $0x38] sm:$0xff] }
 0x3dd   : > { %2749 = vmatpush3.msra.mxu0 %v1940_v30  ;;  %2810 = vmatpush3.msra.mxu1 %v1940_v30  ;;  %v1902_v30 = vmul.f32 %v4545_v47, %v1885_v27  ;;  %v1926_v24 = vadd.f32 %v1910_v36, %v1894_v50  ;;  %v4584_v47 = vld [vmem:[#allocation4 + $0x18] sm:$0xff]  ;;  %v2127_v26 = vld [vmem:[#allocation3 + $0x40] sm:$0xff]  ;;  %2138 = vst.msk [vmem:[%s3906_s10 + $0x18] sm:$0xff] %vm1831_vm1, %v2122_v57  ;;  %v2128_v17 = vld [vmem:[#allocation3 + $0x48] sm:$0xff] }
 0x3de   : > { %2750 = vmatprep.subr.mxu0 %v1939_v35  ;;  %2795 = vmatprep.subr.mxu1 %v1939_v35  ;;  %vm2170_vm5 = vcmp.gt.f32.partialorder %v4584_v47, 0.0  ;;  %2141 = vst.msk [vmem:[%s3906_s10 + $0x30] sm:$0xff] %vm1831_vm1, %v2125_v5  ;;  %2142 = vst.msk [vmem:[%s3906_s10 + $0x38] sm:$0xff] %vm1831_vm1, %v2126_v41  ;;  %v2131_v55 = vld [vmem:[#allocation3 + $0x60] sm:$0xff]  ;;  %v2132_v23 = vld [vmem:[#allocation3 + $0x68] sm:$0xff] }
 0x3df   : > { %2751 = vmatpush3.msra.mxu0 %v1939_v35  ;;  %2811 = vmatpush3.msra.mxu1 %v1939_v35  ;;  %v1925_v35 = vadd.f32 %v1909_v28, %v1893_v38  ;;  %v1934_v60 = vadd.f32 %v1918_v59, %v1902_v30  ;;  %2143 = vst.msk [vmem:[%s3906_s10 + $0x40] sm:$0xff] %vm1831_vm1, %v2127_v26  ;;  %v2133_v19 = vld [vmem:[#allocation3 + $0x70] sm:$0xff]  ;;  %2144 = vst.msk [vmem:[%s3906_s10 + $0x48] sm:$0xff] %vm1831_vm1, %v2128_v17  ;;  %v2134_v21 = vld [vmem:[#allocation3 + $0x78] sm:$0xff] }
 0x3e0   : > { %2752 = vmatprep.subr.mxu0 %v1938_v51  ;;  %2796 = vmatprep.subr.mxu1 %v1938_v51  ;;  %2147 = vst.msk [vmem:[%s3906_s10 + $0x60] sm:$0xff] %vm1831_vm1, %v2131_v55  ;;  %2148 = vst.msk [vmem:[%s3906_s10 + $0x68] sm:$0xff] %vm1831_vm1, %v2132_v23 }
 0x3e1   : > { %2753 = vmatpush3.msra.mxu0 %v1938_v51  ;;  %2812 = vmatpush3.msra.mxu1 %v1938_v51  ;;  %v1933_v51 = vadd.f32 %v1917_v42, %v1901_v61  ;;  %2149 = vst.msk [vmem:[%s3906_s10 + $0x70] sm:$0xff] %vm1831_vm1, %v2133_v19  ;;  %2150 = vst.msk [vmem:[%s3906_s10 + $0x78] sm:$0xff] %vm1831_vm1, %v2134_v21 }
 0x3e2   : > { %2754 = vmatprep.subr.mxu0 %v1937_v20  ;;  %2797 = vmatprep.subr.mxu1 %v1937_v20 }
 0x3e3   : > { %2755 = vmatpush3.msra.mxu0 %v1937_v20  ;;  %2813 = vmatpush3.msra.mxu1 %v1937_v20  ;;  %v4578_v20 = vld [vmem:[#allocation4] sm:$0xff] }
 0x3e4   : > { %2756 = vmatprep.subr.mxu0 %v1936_v2  ;;  %2798 = vmatprep.subr.mxu1 %v1936_v2  ;;  %3131 = vrcp.f32 %v4578_v20  ;;  %vm2167_vm2 = vcmp.gt.f32.partialorder %v4578_v20, 0.0  ;;  %v2620_v20 = vld [vmem:[%s5099_s15] ss:$0 sm:$0xff] }
 0x3e5   : > { %2757 = vmatpush3.msra.mxu0 %v1936_v2  ;;  %2814 = vmatpush3.msra.mxu1 %v1936_v2  ;;  %3133 = vrcp.f32 %v4580_v25  ;;  %v4590_v2 = vld [vmem:[#allocation4 + $0x28] sm:$0xff] }
 0x3e6   : > { %2758 = vmatprep.subr.mxu0 %v1935_v12  ;;  %2799 = vmatprep.subr.mxu1 %v1935_v12  ;;  %3135 = vrcp.f32 %v4582_v46  ;;  %vm2172_vm7 = vcmp.gt.f32.partialorder %v4590_v2, 0.0 }
 0x3e7   : > { %2759 = vmatpush3.msra.mxu0 %v1935_v12  ;;  %2815 = vmatpush3.msra.mxu1 %v1935_v12  ;;  %3137 = vrcp.f32 %v4584_v47  ;;  %v4605_v12 = vld [vmem:[#allocation4 + $0x50] sm:$0xff] }
 0x3e8   : > { %2760 = vmatprep.mubr.f32.mxu0 %v1919_v40  ;;  %2772 = vmatprep.mubr.f32.mxu1 %v1927_v44  ;;  %3139 = vrcp.f32 %v4587_v1  ;;  %v2120_v40 = vld [vmem:[#allocation3 + $0x8] sm:$0xff]  ;;  %v2123_v44 = vld [vmem:[#allocation3 + $0x20] sm:$0xff]  ;;  %vm2177_vm12 = vcmp.gt.f32.partialorder %v4605_v12, 0.0 }
 0x3e9   : > { %2761 = vmatmul.mubr.f32.vlgmr.msra.gmra.mxu0 %v1920_v48  ;;  %2773 = vmatmul.mubr.f32.vlgmr.msra.gmra.mxu1 %v1928_v7  ;;  %3141 = vrcp.f32 %v4590_v2  ;;  %v2124_v48 = vld [vmem:[#allocation3 + $0x28] sm:$0xff]  ;;  %2136 = vst.msk [vmem:[%s3906_s10 + $0x8] sm:$0xff] %vm1831_vm1, %v2120_v40  ;;  %2139 = vst.msk [vmem:[%s3906_s10 + $0x20] sm:$0xff] %vm1831_vm1, %v2123_v44 }
 0x3ea   : > { %2763 = vmatprep.mubr.f32.mxu0 %v1921_v33  ;;  %2775 = vmatprep.mubr.f32.mxu1 %v1929_v34  ;;  %3143 = vrcp.f32 %v4593_v63  ;;  %2140 = vst.msk [vmem:[%s3906_s10 + $0x28] sm:$0xff] %vm1831_vm1, %v2124_v48  ;;  %v2129_v33 = vld [vmem:[#allocation3 + $0x50] sm:$0xff]  ;;  %v2130_v34 = vld [vmem:[#allocation3 + $0x58] sm:$0xff] }
 0x3eb   : > { %3145 = vrcp.f32 %v4596_v0  ;;  %2145 = vst.msk [vmem:[%s3906_s10 + $0x50] sm:$0xff] %vm1831_vm1, %v2129_v33  ;;  %2146 = vst.msk [vmem:[%s3906_s10 + $0x58] sm:$0xff] %vm1831_vm1, %v2130_v34 }
 0x3ec   : > { %3147 = vrcp.f32 %v4599_v52 }
 0x3ed   : > { %2764 = vmatmul.mubr.f32.gmra.mxu0 %v1922_v22  ;;  %2776 = vmatmul.mubr.f32.gmra.mxu1 %v1930_v56  ;;  %3149 = vrcp.f32 %v4602_v3 }
 0x3ee   : > { %2766 = vmatprep.mubr.f32.mxu0 %v1923_v4  ;;  %2778 = vmatprep.mubr.f32.mxu1 %v1931_v37  ;;  %3151 = vrcp.f32 %v4605_v12 }
 0x3ef   : > { %3153 = vrcp.f32 %v4608_v39 }
 0x3f0   : > { %3155 = vrcp.f32 %v4611_v10 }
 0x3f1   : > { %2767 = vmatmul.mubr.f32.gmra.mxu0 %v1924_v49  ;;  %2779 = vmatmul.mubr.f32.gmra.mxu1 %v1932_v31  ;;  %v3132_v58 = vpop.eup %3131  ;;  %3157 = vrcp.f32 %v4615_v6 }
 0x3f2   : > { %2769 = vmatprep.mubr.f32.mxu0 %v1925_v35  ;;  %2781 = vmatprep.mubr.f32.mxu1 %v1933_v51  ;;  %v3134_v9 = vpop.eup %3133  ;;  %3159 = vrcp.f32 %v4618_v8  ;;  %v2215_v18 = vsel %vm2167_vm2, %v3132_v58, 0.0  ;;  %vm2182_vm2 = vcmp.gt.f32.partialorder %v4621_v14, 0.0 }
 0x3f3   : > { %v3136_v43 = vpop.eup %3135  ;;  %3161 = vrcp.f32 %v4621_v14  ;;  %v2216_v13 = vsel %vm2168_vm3, %v3134_v9, 0.0  ;;  %2231 = vst.msk [vmem:[%s3911_s3] sm:$0xff] %vm1831_vm1, %v2215_v18 }
 0x3f4   : > { %v3138_v7 = vpop.eup %3137  ;;  %v2217_v45 = vsel %vm2169_vm4, %v3136_v43, 0.0  ;;  %2232 = vst.msk [vmem:[%s3911_s3 + $0x8] sm:$0xff] %vm1831_vm1, %v2216_v13 }
 0x3f5   : > { %2770 = vmatmul.mubr.f32.gmra.mxu0 %v1926_v24  ;;  %2782 = vmatmul.mubr.f32.gmra.mxu1 %v1934_v60  ;;  %v3140_v16 = vpop.eup %3139  ;;  %v2218_v22 = vsel %vm2170_vm5, %v3138_v7, 0.0  ;;  %2233 = vst.msk [vmem:[%s3911_s3 + $0x10] sm:$0xff] %vm1831_vm1, %v2217_v45 }
 0x3f6   : > { %v3142_v11 = vpop.eup %3141  ;;  %v2219_v56 = vsel %vm2171_vm6, %v3140_v16, 0.0  ;;  %2234 = vst.msk [vmem:[%s3911_s3 + $0x18] sm:$0xff] %vm1831_vm1, %v2218_v22 }
 0x3f7   : > { %v3144_v29 = vpop.eup %3143  ;;  %v2220_v4 = vsel %vm2172_vm7, %v3142_v11, 0.0  ;;  %2235 = vst.msk [vmem:[%s3911_s3 + $0x20] sm:$0xff] %vm1831_vm1, %v2219_v56 }
 0x3f8   : > { %v3146_v53 = vpop.eup %3145  ;;  %v2221_v37 = vsel %vm2173_vm8, %v3144_v29, 0.0  ;;  %2236 = vst.msk [vmem:[%s3911_s3 + $0x28] sm:$0xff] %vm1831_vm1, %v2220_v4 }
 0x3f9   : > { %v3148_v54 = vpop.eup %3147  ;;  %v2222_v38 = vsel %vm2174_vm9, %v3146_v53, 0.0  ;;  %2237 = vst.msk [vmem:[%s3911_s3 + $0x30] sm:$0xff] %vm1831_vm1, %v2221_v37 }
 0x3fa   : > { %v3150_v61 = vpop.eup %3149  ;;  %v2223_v62 = vsel %vm2175_vm10, %v3148_v54, 0.0  ;;  %2238 = vst.msk [vmem:[%s3911_s3 + $0x38] sm:$0xff] %vm1831_vm1, %v2222_v38 }
 0x3fb   : > { %v3152_v27 = vpop.eup %3151  ;;  %v2224_v28 = vsel %vm2176_vm11, %v3150_v61, 0.0  ;;  %2239 = vst.msk [vmem:[%s3911_s3 + $0x40] sm:$0xff] %vm1831_vm1, %v2223_v62 }
 0x3fc   : > { %v3154_v42 = vpop.eup %3153  ;;  %v2225_v49 = vsel %vm2177_vm12, %v3152_v27, 0.0  ;;  %2240 = vst.msk [vmem:[%s3911_s3 + $0x48] sm:$0xff] %vm1831_vm1, %v2224_v28 }
 0x3fd   : > { %v3156_v31 = vpop.eup %3155  ;;  %v2226_v50 = vsel %vm2178_vm13, %v3154_v42, 0.0  ;;  %2241 = vst.msk [vmem:[%s3911_s3 + $0x50] sm:$0xff] %vm1831_vm1, %v2225_v49 }
 0x3fe   : > { %v2227_v30 = vsel %vm2179_vm14, %v3156_v31, 0.0  ;;  %2242 = vst.msk [vmem:[%s3911_s3 + $0x58] sm:$0xff] %vm1831_vm1, %v2226_v50  ;;  %v3158_v35 = vpop.eup %3157 }
 0x3ff   : > { %2243 = vst.msk [vmem:[%s3911_s3 + $0x60] sm:$0xff] %vm1831_vm1, %v2227_v30  ;;  %v3160_v51 = vpop.eup %3159  ;;  %v2228_v36 = vsel %vm2180_vm15, %v3158_v35, 0.0 }
 0x400   : > { %v3162_v59 = vpop.eup %3161  ;;  %v2229_v24 = vsel %vm2181_vm0, %v3160_v51, 0.0  ;;  %2244 = vst.msk [vmem:[%s3911_s3 + $0x68] sm:$0xff] %vm1831_vm1, %v2228_v36 }
 0x401   : > { %v2230_v60 = vsel %vm2182_vm2, %v3162_v59, 0.0  ;;  %2245 = vst.msk [vmem:[%s3911_s3 + $0x70] sm:$0xff] %vm1831_vm1, %v2229_v24 }
 0x402   : > { %2246 = vst.msk [vmem:[%s3911_s3 + $0x78] sm:$0xff] %vm1831_vm1, %v2230_v60 }
 0x4a9   : > { %v2762_v25 = vpop.f32.mrf.mxu0  ;;  %v2774_v46 = vpop.f32.mrf.mxu1 }
 0x4aa   : > { %v2030_v47 = vadd.f32 %v2762_v25, %v2620_v20  ;;  %v2070_v1 = vadd.f32 %v2774_v46, %v2620_v20 }
 0x4ab   : > { %v2024_v2 = vpop.f32.mrf.mxu0  ;;  %v2064_v63 = vpop.f32.mrf.mxu1 }
 0x4ac   : > { %2104 = vst [vmem:[%s3913_s20 + $0x8] sm:$0xff] %v2030_v47  ;;  %2112 = vst [vmem:[%s3913_s20 + $0x48] sm:$0xff] %v2070_v1  ;;  %v2025_v0 = vadd.f32 %v2620_v20, %v2024_v2  ;;  %v2065_v52 = vadd.f32 %v2620_v20, %v2064_v63 }
 0x4ad   : > { %v2765_v3 = vpop.f32.mrf.mxu0  ;;  %v2777_v12 = vpop.f32.mrf.mxu1 }
 0x4ae   : > { %2103 = vst [vmem:[%s3913_s20] sm:$0xff] %v2025_v0  ;;  %2111 = vst [vmem:[%s3913_s20 + $0x40] sm:$0xff] %v2065_v52  ;;  %v2040_v39 = vadd.f32 %v2765_v3, %v2620_v20  ;;  %v2080_v10 = vadd.f32 %v2777_v12, %v2620_v20 }
 0x4af   : > { %v2034_v6 = vpop.f32.mrf.mxu0  ;;  %v2074_v8 = vpop.f32.mrf.mxu1 }
 0x4b0   : > { %2106 = vst [vmem:[%s3913_s20 + $0x18] sm:$0xff] %v2040_v39  ;;  %2114 = vst [vmem:[%s3913_s20 + $0x58] sm:$0xff] %v2080_v10  ;;  %v2035_v58 = vadd.f32 %v2620_v20, %v2034_v6  ;;  %v2075_v14 = vadd.f32 %v2620_v20, %v2074_v8 }
 0x4b1   : > { %v2768_v9 = vpop.f32.mrf.mxu0  ;;  %v2780_v15 = vpop.f32.mrf.mxu1 }
 0x4b2   : > { %2105 = vst [vmem:[%s3913_s20 + $0x10] sm:$0xff] %v2035_v58  ;;  %2113 = vst [vmem:[%s3913_s20 + $0x50] sm:$0xff] %v2075_v14  ;;  %v2050_v40 = vadd.f32 %v2768_v9, %v2620_v20  ;;  %v2090_v32 = vadd.f32 %v2780_v15, %v2620_v20 }
 0x4b3   : > { %v2044_v43 = vpop.f32.mrf.mxu0  ;;  %v2084_v57 = vpop.f32.mrf.mxu1 }
 0x4b4   : > { %2108 = vst [vmem:[%s3913_s20 + $0x28] sm:$0xff] %v2050_v40  ;;  %2116 = vst [vmem:[%s3913_s20 + $0x68] sm:$0xff] %v2090_v32  ;;  %v2045_v44 = vadd.f32 %v2620_v20, %v2044_v43  ;;  %v2085_v48 = vadd.f32 %v2620_v20, %v2084_v57 }
 0x4b5   : > { %v2771_v7 = vpop.f32.mrf.mxu0  ;;  %v2783_v5 = vpop.f32.mrf.mxu1 }
 0x4b6   : > { %2107 = vst [vmem:[%s3913_s20 + $0x20] sm:$0xff] %v2045_v44  ;;  %2115 = vst [vmem:[%s3913_s20 + $0x60] sm:$0xff] %v2085_v48  ;;  %v2060_v41 = vadd.f32 %v2771_v7, %v2620_v20  ;;  %v2100_v26 = vadd.f32 %v2783_v5, %v2620_v20 }
 0x4b7   : > { %v2054_v16 = vpop.f32.mrf.mxu0  ;;  %v2094_v17 = vpop.f32.mrf.mxu1 }
 0x4b8   : > { %2110 = vst [vmem:[%s3913_s20 + $0x38] sm:$0xff] %v2060_v41  ;;  %2118 = vst [vmem:[%s3913_s20 + $0x78] sm:$0xff] %v2100_v26  ;;  %v2055_v33 = vadd.f32 %v2620_v20, %v2054_v16  ;;  %v2095_v34 = vadd.f32 %v2620_v20, %v2094_v17 }
 0x4ba   : > { %2109 = vst [vmem:[%s3913_s20 + $0x30] sm:$0xff] %v2055_v33  ;;  %2117 = vst [vmem:[%s3913_s20 + $0x70] sm:$0xff] %v2095_v34 }
 0x4bb PF: > { %s5100_s17 = sld [smem:[#allocation29_spill]]  ;;  %s2271_s27 = sshll.u32 %s3913_s20, 4  ;;  %s4750_s27 = int_to_ptr.vmem [resolvable:$true] %s2271_s27 }
 0x4bc   : > { %s5101_s29 = sld [smem:[#allocation40_spill]]  ;;  %s2248_s8 = scalar_lea.sflag [#allocation8], %s3884_s4 }
 0x4bd   : > { %s5102_s1 = sld [smem:[#allocation96_spill]]  ;;  %s3329_s16 = scalar_lea.vmem %s4750_s27, 2048 }
 0x4be   : > { %p3330_p11 = scmp.ne.s32.totalorder %s4750_s27, %s3329_s16  ;;  %s3503_s0 = smov [#allocation17]  }
 0x4bf   : > { %s3333_s13 = sshll.u32 %s3503_s0, 4  ;;  %s3334_s13 = int_to_ptr.vmem [resolvable:$false] %s3333_s13 }
 0x4c0   : > { %s3335_s9 = scalar_lea.vmem %s3334_s13, 4096  ;;  %p3336_p6 = scmp.lt.s32.totalorder %s4750_s27, %s3334_s13 }
 0x4c1   : > { %s2631_s14 = sshll.u32 %s5100_s17, 11  ;;  %p3337_p9 = scmp.lt.s32.totalorder %s3335_s9, %s3329_s16 }
 0x4c2   : > { %p5103_p0 = scmp.ne.s32.totalorder %s5101_s29, 0 }
 0x4c3   : > { %s4747_s22 = scalar_lea.hbm %s5102_s1, %s2631_s14  ;;  %p3338_p5 = por %p3337_p9, %p3336_p6 }
 0x4c4   : > { %p3331_p1 = pnand %p3330_p11, %p5103_p0 }
 0x4c6   : > { %p3332_p3 = pneg %p3331_p1 }
 0x4c8   : > { %p3339_p7 = pnand %p3338_p5, %p3332_p3 }
 0x4ca   : > { %3342 = shalt.err (!%p3339_p7)
}
 0x4cb   : > { %s3343_s10 = scalar_lea.hbm %s4747_s22, 2048  ;;  %s3347_s11 = scalar_lea.hbm %s5102_s1, 8192 }
 0x4cc   : > { %p3344_p4 = scmp.ne.s32.totalorder %s4747_s22, %s3343_s10  ;;  %p3348_p13 = scmp.lt.s32.totalorder %s4747_s22, %s5102_s1 }
 0x4cd   : > { %p3349_p2 = scmp.lt.s32.totalorder %s3347_s11, %s3343_s10 }
 0x4ce   : > { %p3345_p12 = pnand %p3344_p4, %p5103_p0 }
 0x4cf   : > { %p3350_p10 = por %p3349_p2, %p3348_p13 }
 0x4d0   : > { %p3346_p8 = pneg %p3345_p12 }
 0x4d2   : > { %p3351_p11 = pnand %p3350_p10, %p3346_p8 }
 0x4d4   : > { %3354 = shalt.err (!%p3351_p11)
}
 0x4d5   : > { %s3504_s28 = smov 128   ;;  %s3505_s2 = smov 8  }
 0x4d6   : > { %2830 = dma.vmem_to_hbm [thread:$0]  (%p5103_p0), %s4750_s27, 2048, %s4747_s22, %s2248_s8, %s3504_s28, %s3504_s28, %s3505_s2  }
 0x4d7 PF: > { %s5104_s18 = sld [smem:[#allocation30_spill]] }
 0x4d8   : > { %s5105_s7 = sld [smem:[#allocation23_spill]] }
 0x4d9   : > { %s5106_s12 = sld [smem:[#allocation36_spill]] }
 0x4dd   : > { %p2859_p1 = scmp.ge.s32.totalorder %s5104_s18, 2 }
 0x4de   : > { %s2294_s30 = sand.u32 1, %s5105_s7  }
 0x4df   : > { %p5107_p3 = scmp.ne.s32.totalorder %s5106_s12, 0  ;;  %s2295_s15 = scalar_lea.sflag [#allocation8], %s2294_s30 }
 0x4e1   : > { %p2853_p6 = pnand %p2859_p1, %p5107_p3 }
 0x4e3   : > { %p2854_p9 = pneg %p2853_p6 }
 0x4e5   : > { %3428 = dma.done.wait (%p2854_p9), %s2295_s15, 2048  }
 0x4e6   : > { %3430 = vsyncadd (%p2854_p9), %s2295_s15, 4294965248  ;;  %s35_s27 = sadd.s32 1, %s5104_s18   ;;  %s5109_s15 = sld [smem:[#allocation24_spill]] }
 0x4e7   : > { %p4780_p5 = scmp.ge.s32.totalorder %s35_s27, 10   ;;  %s5110_s16 = sld [smem:[#allocation25_spill]] }
 0x4e8   : > { %s5111_s4 = sld [smem:[#allocation37_spill]]  ;;  %s5120_s18 = smov %s3449_s19 }
 0x4e9   : > { %s5112_s29 = sld [smem:[#allocation26_spill]]  ;;  %s5122_s20 = smov %s3461_s21 }
 0x4ea   : > { %s5113_s0 = sld [smem:[#allocation32_spill]]  ;;  %s5124_s23 = smov %s3477_s25 }
 0x4eb   : > { %s5114_s14 = sld [smem:[#allocation27_spill]]  ;;  %s5125_s24 = smov %s3481_s26 }
 0x4ec   : > { %s5115_s22 = sld [smem:[#allocation41_spill]] }
 0x4ed   : > { %s5116_s5 = sld [smem:[#allocation31_spill]] }
 0x4ee   : > { %s5117_s6 = sld [smem:[#allocation35_spill]]  ;;  %s5119_s17 = smov %s5111_s4 }
 0x4ef   : > { %s5121_s19 = smov %s5112_s29 }
 0x4f0   :  { %34 = sbr.rel (!%p4780_p5) target bundleno = 27 (0x1b), region = 181 }
 0x4f1   : > { %s5123_s21 = smov %s5114_s14 }
 0x4f3   : > { %s5126_s25 = smov %s5116_s5 }
 0x4f4   : > { %s5127_s26 = smov %s5117_s6 }
 0x4f5   :  { %2316 = vsyncpa [#allocation7], 1 }
 0x4f6   :  { %2318 = vsyncpa [#allocation7 + $0x1], 1 }
 0x4f7   :  { %2319 = vsyncpa [#allocation10], 1 }
 0x4f8   :  { %2321 = vsyncpa [#allocation10 + $0x1], 1 }
 0x4f9   :  { %2322 = vsyncpa [#allocation13], 1 }
 0x4fa   :  { %2324 = vsyncpa [#allocation13 + $0x1], 1 }
 0x4fb   :  { %2325 = vsyncpa [#allocation16], 1 }
 0x4fc   :  { %2326 = vsyncpa [#allocation8], 1 }
 0x4fd   :  { %2328 = vsyncpa [#allocation8 + $0x1], 1 }

</bundles_post_ra>
